<compile_context>
chip_gen: v7x
topology: tpu7x:2x2x1
jax: 0.10.0
libtpu: 0.0.40
codegen_flags: <defaults>
</compile_context>

<pallas_src>
import functools

import jax
import jax.numpy as jnp
from jax import lax
from jax.experimental import pallas as pl
from jax.experimental.pallas import tpu as pltpu


def _lstm_ann_kernel(num_layers, num_targets, hidden_size, batch, seq_len,
                     compute_dtype, *refs):
    """Whole forward pass (stacked LSTM + both ANN heads) in one kernel."""
    x_ref = refs[0]                              # (T*B, I) time-major, compute_dtype
    idx = 1
    lstm_refs = []
    for _ in range(num_layers):
        lstm_refs.append((refs[idx], refs[idx + 1], refs[idx + 2]))
        idx += 3
    (pw1, pb1, pw2, pb2, pw3, pb3, aw1, ab1, aw3, ab3) = refs[idx:idx + 10]
    idx += 10
    final_out_ref = refs[idx]                    # (1, num_targets) f32
    attn_ref = refs[idx + 1]                     # (1, N) f32, lane-dense, time-major cols
    seq_ref = refs[idx + 2]                      # VMEM scratch (N, H) compute_dtype
    xproj_ref = refs[idx + 3]                    # VMEM scratch (N, 4H) f32

    H = hidden_size
    B = batch
    T = seq_len
    N = B * T
    f32 = jnp.float32
    cdt = compute_dtype

    # ---- stacked LSTM ----
    for layer, (wih_ref, whh_ref, b_ref) in enumerate(lstm_refs):
        wih = wih_ref[...]                       # (Din, 4H) compute_dtype, g-cols *2
        whh = whh_ref[...]                       # (H,   4H) compute_dtype, g-cols *2
        b = b_ref[...]                           # (1,   4H) f32 = (b_ih+b_hh), g *2

        src = x_ref[...] if layer == 0 else seq_ref[...]   # (N, Din) compute_dtype

        # Hoisted input projection: one (N, Din)x(Din, 4H) matmul + bias, staged
        # in a VMEM scratch so it is not held live in vregs across the time loop.
        xproj_ref[...] = jnp.dot(src, wih, preferred_element_type=f32) + b

        def step(t, carry, whh=whh):
            h, c = carry                         # (B, H) f32 state
            r = pl.multiple_of(t * B, B)
            gates = xproj_ref[pl.ds(r, B), :] + jnp.dot(
                h.astype(cdt), whh, preferred_element_type=f32)   # (B, 4H) f32
            # Single full-width sigmoid; tanh(x) = 2*sigmoid(2x) - 1 (g pre-scaled).
            s = jax.nn.sigmoid(gates)
            i_g = s[:, 0 * H:1 * H]
            f_g = s[:, 1 * H:2 * H]
            g_g = 2.0 * s[:, 2 * H:3 * H] - 1.0
            o_g = s[:, 3 * H:4 * H]
            c = f_g * c + i_g * g_g
            h = o_g * jnp.tanh(c)
            seq_ref[pl.ds(r, B), :] = h.astype(cdt)   # time-major row block
            return h, c

        h0 = jnp.zeros((B, H), f32)
        c0 = jnp.zeros((B, H), f32)
        lax.fori_loop(0, T, step, (h0, c0), unroll=True)

    h_out = seq_ref[...]                         # (N, H) compute_dtype

    # ---- prediction head ----
    pred_in = jnp.maximum(h_out, 0.0)            # relu commutes with the cdt cast
    p = jnp.maximum(
        jnp.dot(pred_in, pw1[...], preferred_element_type=f32) + pb1[...], 0.0)
    p = jnp.dot(p.astype(cdt), pw2[...], preferred_element_type=f32) + pb2[...]
    out_pred = (jnp.dot(p.astype(cdt), pw3[...], preferred_element_type=f32)
                + pb3[...])                      # (N, num_targets) f32

    # ---- attention head ----
    # NOTE: aann_fc_2's result is overwritten in the reference forward (dead
    # code), so it is intentionally not computed here.
    attn_in = jnp.dot(h_out, aw1[...], preferred_element_type=f32) + ab1[...]
    foa = jnp.maximum(attn_in, 0.0)
    logits = (jnp.dot(foa.astype(cdt), aw3[...], preferred_element_type=f32)
              + ab3[...])                        # (N, 1) f32

    # softmax over dim 0 (across all B*T rows), as in nn.Softmax(dim=0)
    m = jnp.max(logits, axis=0, keepdims=True)
    e = jnp.exp(logits - m)
    denom = jnp.sum(e, axis=0, keepdims=True)
    attn_col = e * pl.reciprocal(denom, approx=True)                 # (N, 1)

    # final_out = sum_n out_pred[n, :] * attn[n]  (row-permutation invariant)
    final_out = jnp.sum(out_pred * attn_col, axis=0)                 # (num_targets,)
    final_out_ref[...] = final_out.reshape(1, num_targets)

    # Lane-dense attention output: transpose the (N, 1) column to a (1, N) row
    # via an iota mask + sublane reduce (exact; all ops lower reliably).
    rows = lax.broadcasted_iota(jnp.int32, (N, N), 0)
    cols = lax.broadcasted_iota(jnp.int32, (N, N), 1)
    attn_ref[...] = jnp.sum(jnp.where(rows == cols, attn_col, 0.0),
                            axis=0, keepdims=True)                   # (1, N)


def pack_params(params, *, num_layers, hidden_size, compute_dtype=jnp.bfloat16):
    """One-time parameter packing (hoisted out of the forward path).

    Transposes weights to (in, out), folds b_ih+b_hh, pre-scales the g-gate
    (cell candidate) columns by 2 so the kernel can use a single sigmoid
    (tanh(x) = 2*sigmoid(2x) - 1), and casts MXU operands to compute_dtype.
    Must be called with the same compute_dtype later passed to the forward.
    """
    H = hidden_size
    gate_scale = jnp.concatenate([
        jnp.ones((2 * H,), jnp.float32),
        jnp.full((H,), 2.0, jnp.float32),
        jnp.ones((H,), jnp.float32),
    ])
    packed = []
    for l in range(num_layers):
        wih, whh, bih, bhh = params[f"lstm_{l}"]
        packed.append((wih.T * gate_scale[None, :]).astype(compute_dtype))  # (Din, 4H)
        packed.append((whh.T * gate_scale[None, :]).astype(compute_dtype))  # (H,   4H)
        packed.append(((bih + bhh) * gate_scale).reshape(1, -1).astype(jnp.float32))
    for name in ("pann_fc_1", "pann_fc_2", "pann_fc_3", "aann_fc_1", "aann_fc_3"):
        w, b = params[name]
        packed.append(w.T.astype(compute_dtype))
        packed.append(b.reshape(1, -1).astype(jnp.float32))
    # TODO(synk): aann_fc_2 / its ReLU are dead code in the reference forward; omitted.
    return tuple(jax.device_put(p) for p in packed)


@functools.partial(jax.jit, static_argnames=("num_targets", "hidden_size",
                                             "num_layers", "compute_dtype"))
def lstm_ann_forward(x, packed_params, *, num_targets, hidden_size, num_layers,
                     compute_dtype=jnp.bfloat16):
    B, T, I = x.shape
    N = B * T
    H = hidden_size

    # Time-major layout so per-timestep rows are contiguous inside the kernel.
    x_tm = jnp.transpose(x, (1, 0, 2)).reshape(N, I).astype(compute_dtype)
    inputs = (x_tm,) + tuple(packed_params)

    kernel = functools.partial(_lstm_ann_kernel, num_layers, num_targets,
                               hidden_size, B, T, compute_dtype)
    out_shapes = (jax.ShapeDtypeStruct((1, num_targets), jnp.float32),
                  jax.ShapeDtypeStruct((1, N), jnp.float32))
    in_specs = [pl.BlockSpec(memory_space=pltpu.MemorySpace.VMEM)] * len(inputs)
    out_specs = (pl.BlockSpec(memory_space=pltpu.MemorySpace.VMEM),
                 pl.BlockSpec(memory_space=pltpu.MemorySpace.VMEM))
    scratch_shapes = [pltpu.VMEM((N, H), compute_dtype),        # sequence (h per step)
                      pltpu.VMEM((N, 4 * H), jnp.float32)]      # hoisted x-projection

    # Explicit VMEM budget (v7x has 64 MiB per TC): inputs + outputs + scratch,
    # with generous headroom for tile padding / internal scratch.
    vmem_bytes = sum(int(a.size) * jnp.dtype(a.dtype).itemsize for a in inputs)
    vmem_bytes += N * H * jnp.dtype(compute_dtype).itemsize      # seq scratch
    vmem_bytes += N * 4 * H * 4                                  # x-proj scratch
    vmem_bytes += (N + num_targets) * 4                          # outputs
    vmem_limit = int(min(max(8 * vmem_bytes, 16 * 1024 * 1024), 64 * 1024 * 1024))

    final_out, attn_row = pl.pallas_call(
        kernel,
        out_shape=out_shapes,
        in_specs=in_specs,
        out_specs=out_specs,
        scratch_shapes=scratch_shapes,
        compiler_params=pltpu.CompilerParams(vmem_limit_bytes=vmem_limit),
    )(*inputs)

    # Kernel columns are time-major (t*B + b); reorder to batch-major (b*T + t)
    # to match ula.view(-1, hidden_size), then broadcast (cheap XLA ops).
    attn_bm = attn_row.reshape(T, B).T.reshape(1, N)
    attn_final = jnp.broadcast_to(attn_bm, (num_targets, N))
    return final_out.reshape(num_targets), attn_final


def _reference(x, params, *, num_targets, hidden_size, num_layers):
    """Pure-JAX f32 reference mirroring the PyTorch forward (for verification)."""
    B, T, _ = x.shape
    H = hidden_size
    inp = x
    for l in range(num_layers):
        wih, whh, bih, bhh = params[f"lstm_{l}"]
        h = jnp.zeros((B, H), jnp.float32)
        c = jnp.zeros((B, H), jnp.float32)
        outs = []
        for t in range(T):
            g = inp[:, t, :] @ wih.T + h @ whh.T + bih + bhh
            i_g = jax.nn.sigmoid(g[:, :H])
            f_g = jax.nn.sigmoid(g[:, H:2 * H])
            g_g = jnp.tanh(g[:, 2 * H:3 * H])
            o_g = jax.nn.sigmoid(g[:, 3 * H:])
            c = f_g * c + i_g * g_g
            h = o_g * jnp.tanh(c)
            outs.append(h)
        inp = jnp.stack(outs, axis=1)
    h_out = inp.reshape(-1, H)

    def lin(name, z):
        w, b = params[name]
        return z @ w.T + b

    pred_in = jax.nn.relu(h_out)
    p = jax.nn.relu(lin("pann_fc_1", pred_in))
    p = lin("pann_fc_2", p)
    out_pred = lin("pann_fc_3", p)
    attn_in = lin("aann_fc_1", h_out)
    foa = jax.nn.relu(attn_in)
    attn = jax.nn.softmax(lin("aann_fc_3", foa), axis=0)
    attn_final = jnp.broadcast_to(attn.T, (num_targets, h_out.shape[0]))
    final_out = jnp.sum(out_pred.T * attn_final, axis=1)
    return final_out, attn_final


def init_params(key, *, num_targets, input_size, hidden_size, num_layers):
    """Deterministic uniform(-k, k) init mimicking PyTorch default shapes."""
    params = {}
    kidx = [0]
    keys = jax.random.split(key, 8 * num_layers + 16)

    def nxt():
        k = keys[kidx[0]]
        kidx[0] += 1
        return k

    def unif(shape, bound):
        return jax.random.uniform(nxt(), shape, jnp.float32, -bound, bound)

    k_lstm = 1.0 / jnp.sqrt(hidden_size)
    for l in range(num_layers):
        din = input_size if l == 0 else hidden_size
        params[f"lstm_{l}"] = (
            unif((4 * hidden_size, din), k_lstm),
            unif((4 * hidden_size, hidden_size), k_lstm),
            unif((4 * hidden_size,), k_lstm),
            unif((4 * hidden_size,), k_lstm),
        )

    def linear(out_f, in_f):
        k = 1.0 / jnp.sqrt(in_f)
        return unif((out_f, in_f), k), unif((out_f,), k)

    params["pann_fc_1"] = linear(hidden_size, hidden_size)
    params["pann_fc_2"] = linear(hidden_size, hidden_size)
    params["pann_fc_3"] = linear(num_targets, hidden_size)
    params["aann_fc_1"] = linear(hidden_size, hidden_size)
    params["aann_fc_3"] = linear(1, hidden_size)
    return params


if __name__ == "__main__":
    B, T, I, H = 2, 8, 16, 32
    NUM_TARGETS, NUM_LAYERS = 4, 2

    key = jax.random.PRNGKey(0)
    kx, kp = jax.random.split(key)
    x = jax.random.normal(kx, (B, T, I), jnp.float32)
    params = init_params(kp, num_targets=NUM_TARGETS, input_size=I,
                         hidden_size=H, num_layers=NUM_LAYERS)

    ref_final, ref_attn = _reference(
        x, params, num_targets=NUM_TARGETS, hidden_size=H, num_layers=NUM_LAYERS)

    # f32-operand kernel: tight check (structural changes are numerically exact
    # up to f32 rounding + the approx reciprocal in the softmax).
    packed_f32 = pack_params(params, num_layers=NUM_LAYERS, hidden_size=H,
                             compute_dtype=jnp.float32)
    f32_final, f32_attn = lstm_ann_forward(
        x, packed_f32, num_targets=NUM_TARGETS, hidden_size=H,
        num_layers=NUM_LAYERS, compute_dtype=jnp.float32)
    jax.block_until_ready((f32_final, f32_attn))
    assert jnp.allclose(f32_final, ref_final, atol=2e-3, rtol=2e-3)
    assert jnp.allclose(f32_attn, ref_attn, atol=2e-3, rtol=2e-3)

    # Default bf16-MXU-operand kernel (v5e/v6e/v7x friendly): looser check since
    # matmul inputs + sequence scratch are bf16 (state/gates/softmax stay f32).
    packed_bf16 = pack_params(params, num_layers=NUM_LAYERS, hidden_size=H,
                              compute_dtype=jnp.bfloat16)
    final_out, attn_final = lstm_ann_forward(
        x, packed_bf16, num_targets=NUM_TARGETS, hidden_size=H,
        num_layers=NUM_LAYERS)
    jax.block_until_ready((final_out, attn_final))
    assert final_out.shape == (NUM_TARGETS,)
    assert attn_final.shape == (NUM_TARGETS, B * T)
    assert jnp.allclose(final_out, ref_final, atol=5e-2, rtol=5e-2)
    assert jnp.allclose(attn_final, ref_attn, atol=1e-2, rtol=5e-2)

    print("KERNEL_OK")
</pallas_src>

<mosaic_0001>
module attributes {stable_mosaic.version = 11 : i64} {
  func.func @_lstm_ann_kernel(%arg0: memref<16x16xf32, #tpu.memory_space<vmem>>, %arg1: memref<16x128xf32, #tpu.memory_space<vmem>>, %arg2: memref<32x128xf32, #tpu.memory_space<vmem>>, %arg3: memref<1x128xf32, #tpu.memory_space<vmem>>, %arg4: memref<32x128xf32, #tpu.memory_space<vmem>>, %arg5: memref<32x128xf32, #tpu.memory_space<vmem>>, %arg6: memref<1x128xf32, #tpu.memory_space<vmem>>, %arg7: memref<32x32xf32, #tpu.memory_space<vmem>>, %arg8: memref<1x32xf32, #tpu.memory_space<vmem>>, %arg9: memref<32x32xf32, #tpu.memory_space<vmem>>, %arg10: memref<1x32xf32, #tpu.memory_space<vmem>>, %arg11: memref<32x4xf32, #tpu.memory_space<vmem>>, %arg12: memref<1x4xf32, #tpu.memory_space<vmem>>, %arg13: memref<32x32xf32, #tpu.memory_space<vmem>>, %arg14: memref<1x32xf32, #tpu.memory_space<vmem>>, %arg15: memref<32x1xf32, #tpu.memory_space<vmem>>, %arg16: memref<1x1xf32, #tpu.memory_space<vmem>>, %arg17: memref<1x4xf32, #tpu.memory_space<vmem>>, %arg18: memref<1x16xf32, #tpu.memory_space<vmem>>, %arg19: memref<16x32xf32, #tpu.memory_space<vmem>>, %arg20: memref<16x128xf32, #tpu.memory_space<vmem>>) attributes {dimension_semantics = [], scalar_prefetch = 0 : i64, scratch_operands = 2 : i64, tpu.core_type = #tpu.core_type<tc>} {
    %c0 = arith.constant 0 : index
    %c0_0 = arith.constant 0 : index
    %0 = vector.load %arg1[%c0, %c0_0] : memref<16x128xf32, #tpu.memory_space<vmem>>, vector<16x128xf32>
    %c0_1 = arith.constant 0 : index
    %c0_2 = arith.constant 0 : index
    %1 = vector.load %arg2[%c0_1, %c0_2] : memref<32x128xf32, #tpu.memory_space<vmem>>, vector<32x128xf32>
    %c0_3 = arith.constant 0 : index
    %c0_4 = arith.constant 0 : index
    %2 = vector.load %arg3[%c0_3, %c0_4] : memref<1x128xf32, #tpu.memory_space<vmem>>, vector<1x128xf32>
    %c0_5 = arith.constant 0 : index
    %c0_6 = arith.constant 0 : index
    %3 = vector.load %arg0[%c0_5, %c0_6] : memref<16x16xf32, #tpu.memory_space<vmem>>, vector<16x16xf32>
    %cst = arith.constant dense<0.000000e+00> : vector<16x128xf32>
    %4 = tpu.matmul %3, %0, %cst {dimension_numbers = #tpu.dot_dimension_numbers<[1], [0], [0], [1], [0, 0, 1, 1], [], []>} : vector<16x16xf32>, vector<16x128xf32>, vector<16x128xf32> -> vector<16x128xf32>
    %5 = vector.broadcast %2 : vector<1x128xf32> to vector<16x128xf32>
    %6 = arith.addf %4, %5 : vector<16x128xf32>
    %c0_7 = arith.constant 0 : index
    %c0_8 = arith.constant 0 : index
    %7 = vector.load %arg20[%c0_7, %c0_8] : memref<16x128xf32, #tpu.memory_space<vmem>>, vector<16x128xf32>
    tpu.vector_store %arg20[%c0_7, %c0_8], %6 {strides = array<i32>} : memref<16x128xf32, #tpu.memory_space<vmem>>, vector<16x128xf32>,
    %cst_9 = arith.constant 0.000000e+00 : f32
    %8 = vector.broadcast %cst_9 : f32 to vector<2x32xf32>
    %cst_10 = arith.constant 0.000000e+00 : f32
    %9 = vector.broadcast %cst_10 : f32 to vector<2x32xf32>
    %c0_i32 = arith.constant 0 : i32
    %c2_i32 = arith.constant 2 : i32
    %10 = arith.muli %c0_i32, %c2_i32 : i32
    %11 = tpu.assume_multiple %10, 2 : i32
    %12 = arith.index_cast %11 : i32 to index
    %c0_11 = arith.constant 0 : index
    %13 = vector.load %arg20[%12, %c0_11] : memref<16x128xf32, #tpu.memory_space<vmem>>, vector<2x128xf32>
    %cst_12 = arith.constant dense<0.000000e+00> : vector<2x128xf32>
    %14 = tpu.matmul %8, %1, %cst_12 {dimension_numbers = #tpu.dot_dimension_numbers<[1], [0], [0], [1], [0, 0, 1, 1], [], []>} : vector<2x32xf32>, vector<32x128xf32>, vector<2x128xf32> -> vector<2x128xf32>
    %15 = arith.addf %13, %14 : vector<2x128xf32>
    %16 = arith.negf %15 : vector<2x128xf32>
    %17 = math.exp %16 : vector<2x128xf32>
    %cst_13 = arith.constant 1.000000e+00 : f32
    %18 = vector.broadcast %cst_13 : f32 to vector<2x128xf32>
    %19 = arith.addf %18, %17 : vector<2x128xf32>
    %20 = arith.divf %18, %19 : vector<2x128xf32>
    %21 = vector.extract_strided_slice %20 {offsets = [0, 0], sizes = [2, 32], strides = [1, 1]} : vector<2x128xf32> to vector<2x32xf32>
    %22 = vector.extract_strided_slice %20 {offsets = [0, 32], sizes = [2, 32], strides = [1, 1]} : vector<2x128xf32> to vector<2x32xf32>
    %23 = vector.extract_strided_slice %20 {offsets = [0, 64], sizes = [2, 32], strides = [1, 1]} : vector<2x128xf32> to vector<2x32xf32>
    %cst_14 = arith.constant 2.000000e+00 : f32
    %24 = vector.broadcast %cst_14 : f32 to vector<2x32xf32>
    %25 = arith.mulf %24, %23 : vector<2x32xf32>
    %cst_15 = arith.constant 1.000000e+00 : f32
    %26 = vector.broadcast %cst_15 : f32 to vector<2x32xf32>
    %27 = arith.subf %25, %26 : vector<2x32xf32>
    %28 = vector.extract_strided_slice %20 {offsets = [0, 96], sizes = [2, 32], strides = [1, 1]} : vector<2x128xf32> to vector<2x32xf32>
    %29 = arith.mulf %22, %9 : vector<2x32xf32>
    %30 = arith.mulf %21, %27 : vector<2x32xf32>
    %31 = arith.addf %29, %30 : vector<2x32xf32>
    %32 = math.tanh %31 : vector<2x32xf32>
    %33 = arith.mulf %28, %32 : vector<2x32xf32>
    %34 = arith.index_cast %11 : i32 to index
    %c0_16 = arith.constant 0 : index
    %35 = vector.load %arg19[%34, %c0_16] : memref<16x32xf32, #tpu.memory_space<vmem>>, vector<2x32xf32>
    tpu.vector_store %arg19[%34, %c0_16], %33 {strides = array<i32>} : memref<16x32xf32, #tpu.memory_space<vmem>>, vector<2x32xf32>,
    %c1_i32 = arith.constant 1 : i32
    %c2_i32_17 = arith.constant 2 : i32
    %36 = arith.muli %c1_i32, %c2_i32_17 : i32
    %37 = tpu.assume_multiple %36, 2 : i32
    %38 = arith.index_cast %37 : i32 to index
    %c0_18 = arith.constant 0 : index
    %39 = vector.load %arg20[%38, %c0_18] : memref<16x128xf32, #tpu.memory_space<vmem>>, vector<2x128xf32>
    %cst_19 = arith.constant dense<0.000000e+00> : vector<2x128xf32>
    %40 = tpu.matmul %33, %1, %cst_19 {dimension_numbers = #tpu.dot_dimension_numbers<[1], [0], [0], [1], [0, 0, 1, 1], [], []>} : vector<2x32xf32>, vector<32x128xf32>, vector<2x128xf32> -> vector<2x128xf32>
    %41 = arith.addf %39, %40 : vector<2x128xf32>
    %42 = arith.negf %41 : vector<2x128xf32>
    %43 = math.exp %42 : vector<2x128xf32>
    %cst_20 = arith.constant 1.000000e+00 : f32
    %44 = vector.broadcast %cst_20 : f32 to vector<2x128xf32>
    %45 = arith.addf %44, %43 : vector<2x128xf32>
    %46 = arith.divf %44, %45 : vector<2x128xf32>
    %47 = vector.extract_strided_slice %46 {offsets = [0, 0], sizes = [2, 32], strides = [1, 1]} : vector<2x128xf32> to vector<2x32xf32>
    %48 = vector.extract_strided_slice %46 {offsets = [0, 32], sizes = [2, 32], strides = [1, 1]} : vector<2x128xf32> to vector<2x32xf32>
    %49 = vector.extract_strided_slice %46 {offsets = [0, 64], sizes = [2, 32], strides = [1, 1]} : vector<2x128xf32> to vector<2x32xf32>
    %cst_21 = arith.constant 2.000000e+00 : f32
    %50 = vector.broadcast %cst_21 : f32 to vector<2x32xf32>
    %51 = arith.mulf %50, %49 : vector<2x32xf32>
    %cst_22 = arith.constant 1.000000e+00 : f32
    %52 = vector.broadcast %cst_22 : f32 to vector<2x32xf32>
    %53 = arith.subf %51, %52 : vector<2x32xf32>
    %54 = vector.extract_strided_slice %46 {offsets = [0, 96], sizes = [2, 32], strides = [1, 1]} : vector<2x128xf32> to vector<2x32xf32>
    %55 = arith.mulf %48, %31 : vector<2x32xf32>
    %56 = arith.mulf %47, %53 : vector<2x32xf32>
    %57 = arith.addf %55, %56 : vector<2x32xf32>
    %58 = math.tanh %57 : vector<2x32xf32>
    %59 = arith.mulf %54, %58 : vector<2x32xf32>
    %60 = arith.index_cast %37 : i32 to index
    %c0_23 = arith.constant 0 : index
    %61 = vector.load %arg19[%60, %c0_23] : memref<16x32xf32, #tpu.memory_space<vmem>>, vector<2x32xf32>
    tpu.vector_store %arg19[%60, %c0_23], %59 {strides = array<i32>} : memref<16x32xf32, #tpu.memory_space<vmem>>, vector<2x32xf32>,
    %c2_i32_24 = arith.constant 2 : i32
    %c2_i32_25 = arith.constant 2 : i32
    %62 = arith.muli %c2_i32_24, %c2_i32_25 : i32
    %63 = tpu.assume_multiple %62, 2 : i32
    %64 = arith.index_cast %63 : i32 to index
    %c0_26 = arith.constant 0 : index
    %65 = vector.load %arg20[%64, %c0_26] : memref<16x128xf32, #tpu.memory_space<vmem>>, vector<2x128xf32>
    %cst_27 = arith.constant dense<0.000000e+00> : vector<2x128xf32>
    %66 = tpu.matmul %59, %1, %cst_27 {dimension_numbers = #tpu.dot_dimension_numbers<[1], [0], [0], [1], [0, 0, 1, 1], [], []>} : vector<2x32xf32>, vector<32x128xf32>, vector<2x128xf32> -> vector<2x128xf32>
    %67 = arith.addf %65, %66 : vector<2x128xf32>
    %68 = arith.negf %67 : vector<2x128xf32>
    %69 = math.exp %68 : vector<2x128xf32>
    %cst_28 = arith.constant 1.000000e+00 : f32
    %70 = vector.broadcast %cst_28 : f32 to vector<2x128xf32>
    %71 = arith.addf %70, %69 : vector<2x128xf32>
    %72 = arith.divf %70, %71 : vector<2x128xf32>
    %73 = vector.extract_strided_slice %72 {offsets = [0, 0], sizes = [2, 32], strides = [1, 1]} : vector<2x128xf32> to vector<2x32xf32>
    %74 = vector.extract_strided_slice %72 {offsets = [0, 32], sizes = [2, 32], strides = [1, 1]} : vector<2x128xf32> to vector<2x32xf32>
    %75 = vector.extract_strided_slice %72 {offsets = [0, 64], sizes = [2, 32], strides = [1, 1]} : vector<2x128xf32> to vector<2x32xf32>
    %cst_29 = arith.constant 2.000000e+00 : f32
    %76 = vector.broadcast %cst_29 : f32 to vector<2x32xf32>
    %77 = arith.mulf %76, %75 : vector<2x32xf32>
    %cst_30 = arith.constant 1.000000e+00 : f32
    %78 = vector.broadcast %cst_30 : f32 to vector<2x32xf32>
    %79 = arith.subf %77, %78 : vector<2x32xf32>
    %80 = vector.extract_strided_slice %72 {offsets = [0, 96], sizes = [2, 32], strides = [1, 1]} : vector<2x128xf32> to vector<2x32xf32>
    %81 = arith.mulf %74, %57 : vector<2x32xf32>
    %82 = arith.mulf %73, %79 : vector<2x32xf32>
    %83 = arith.addf %81, %82 : vector<2x32xf32>
    %84 = math.tanh %83 : vector<2x32xf32>
    %85 = arith.mulf %80, %84 : vector<2x32xf32>
    %86 = arith.index_cast %63 : i32 to index
    %c0_31 = arith.constant 0 : index
    %87 = vector.load %arg19[%86, %c0_31] : memref<16x32xf32, #tpu.memory_space<vmem>>, vector<2x32xf32>
    tpu.vector_store %arg19[%86, %c0_31], %85 {strides = array<i32>} : memref<16x32xf32, #tpu.memory_space<vmem>>, vector<2x32xf32>,
    %c3_i32 = arith.constant 3 : i32
    %c2_i32_32 = arith.constant 2 : i32
    %88 = arith.muli %c3_i32, %c2_i32_32 : i32
    %89 = tpu.assume_multiple %88, 2 : i32
    %90 = arith.index_cast %89 : i32 to index
    %c0_33 = arith.constant 0 : index
    %91 = vector.load %arg20[%90, %c0_33] : memref<16x128xf32, #tpu.memory_space<vmem>>, vector<2x128xf32>
    %cst_34 = arith.constant dense<0.000000e+00> : vector<2x128xf32>
    %92 = tpu.matmul %85, %1, %cst_34 {dimension_numbers = #tpu.dot_dimension_numbers<[1], [0], [0], [1], [0, 0, 1, 1], [], []>} : vector<2x32xf32>, vector<32x128xf32>, vector<2x128xf32> -> vector<2x128xf32>
    %93 = arith.addf %91, %92 : vector<2x128xf32>
    %94 = arith.negf %93 : vector<2x128xf32>
    %95 = math.exp %94 : vector<2x128xf32>
    %cst_35 = arith.constant 1.000000e+00 : f32
    %96 = vector.broadcast %cst_35 : f32 to vector<2x128xf32>
    %97 = arith.addf %96, %95 : vector<2x128xf32>
    %98 = arith.divf %96, %97 : vector<2x128xf32>
    %99 = vector.extract_strided_slice %98 {offsets = [0, 0], sizes = [2, 32], strides = [1, 1]} : vector<2x128xf32> to vector<2x32xf32>
    %100 = vector.extract_strided_slice %98 {offsets = [0, 32], sizes = [2, 32], strides = [1, 1]} : vector<2x128xf32> to vector<2x32xf32>
    %101 = vector.extract_strided_slice %98 {offsets = [0, 64], sizes = [2, 32], strides = [1, 1]} : vector<2x128xf32> to vector<2x32xf32>
    %cst_36 = arith.constant 2.000000e+00 : f32
    %102 = vector.broadcast %cst_36 : f32 to vector<2x32xf32>
    %103 = arith.mulf %102, %101 : vector<2x32xf32>
    %cst_37 = arith.constant 1.000000e+00 : f32
    %104 = vector.broadcast %cst_37 : f32 to vector<2x32xf32>
    %105 = arith.subf %103, %104 : vector<2x32xf32>
    %106 = vector.extract_strided_slice %98 {offsets = [0, 96], sizes = [2, 32], strides = [1, 1]} : vector<2x128xf32> to vector<2x32xf32>
    %107 = arith.mulf %100, %83 : vector<2x32xf32>
    %108 = arith.mulf %99, %105 : vector<2x32xf32>
    %109 = arith.addf %107, %108 : vector<2x32xf32>
    %110 = math.tanh %109 : vector<2x32xf32>
    %111 = arith.mulf %106, %110 : vector<2x32xf32>
    %112 = arith.index_cast %89 : i32 to index
    %c0_38 = arith.constant 0 : index
    %113 = vector.load %arg19[%112, %c0_38] : memref<16x32xf32, #tpu.memory_space<vmem>>, vector<2x32xf32>
    tpu.vector_store %arg19[%112, %c0_38], %111 {strides = array<i32>} : memref<16x32xf32, #tpu.memory_space<vmem>>, vector<2x32xf32>,
    %c4_i32 = arith.constant 4 : i32
    %c2_i32_39 = arith.constant 2 : i32
    %114 = arith.muli %c4_i32, %c2_i32_39 : i32
    %115 = tpu.assume_multiple %114, 2 : i32
    %116 = arith.index_cast %115 : i32 to index
    %c0_40 = arith.constant 0 : index
    %117 = vector.load %arg20[%116, %c0_40] : memref<16x128xf32, #tpu.memory_space<vmem>>, vector<2x128xf32>
    %cst_41 = arith.constant dense<0.000000e+00> : vector<2x128xf32>
    %118 = tpu.matmul %111, %1, %cst_41 {dimension_numbers = #tpu.dot_dimension_numbers<[1], [0], [0], [1], [0, 0, 1, 1], [], []>} : vector<2x32xf32>, vector<32x128xf32>, vector<2x128xf32> -> vector<2x128xf32>
    %119 = arith.addf %117, %118 : vector<2x128xf32>
    %120 = arith.negf %119 : vector<2x128xf32>
    %121 = math.exp %120 : vector<2x128xf32>
    %cst_42 = arith.constant 1.000000e+00 : f32
    %122 = vector.broadcast %cst_42 : f32 to vector<2x128xf32>
    %123 = arith.addf %122, %121 : vector<2x128xf32>
    %124 = arith.divf %122, %123 : vector<2x128xf32>
    %125 = vector.extract_strided_slice %124 {offsets = [0, 0], sizes = [2, 32], strides = [1, 1]} : vector<2x128xf32> to vector<2x32xf32>
    %126 = vector.extract_strided_slice %124 {offsets = [0, 32], sizes = [2, 32], strides = [1, 1]} : vector<2x128xf32> to vector<2x32xf32>
    %127 = vector.extract_strided_slice %124 {offsets = [0, 64], sizes = [2, 32], strides = [1, 1]} : vector<2x128xf32> to vector<2x32xf32>
    %cst_43 = arith.constant 2.000000e+00 : f32
    %128 = vector.broadcast %cst_43 : f32 to vector<2x32xf32>
    %129 = arith.mulf %128, %127 : vector<2x32xf32>
    %cst_44 = arith.constant 1.000000e+00 : f32
    %130 = vector.broadcast %cst_44 : f32 to vector<2x32xf32>
    %131 = arith.subf %129, %130 : vector<2x32xf32>
    %132 = vector.extract_strided_slice %124 {offsets = [0, 96], sizes = [2, 32], strides = [1, 1]} : vector<2x128xf32> to vector<2x32xf32>
    %133 = arith.mulf %126, %109 : vector<2x32xf32>
    %134 = arith.mulf %125, %131 : vector<2x32xf32>
    %135 = arith.addf %133, %134 : vector<2x32xf32>
    %136 = math.tanh %135 : vector<2x32xf32>
    %137 = arith.mulf %132, %136 : vector<2x32xf32>
    %138 = arith.index_cast %115 : i32 to index
    %c0_45 = arith.constant 0 : index
    %139 = vector.load %arg19[%138, %c0_45] : memref<16x32xf32, #tpu.memory_space<vmem>>, vector<2x32xf32>
    tpu.vector_store %arg19[%138, %c0_45], %137 {strides = array<i32>} : memref<16x32xf32, #tpu.memory_space<vmem>>, vector<2x32xf32>,
    %c5_i32 = arith.constant 5 : i32
    %c2_i32_46 = arith.constant 2 : i32
    %140 = arith.muli %c5_i32, %c2_i32_46 : i32
    %141 = tpu.assume_multiple %140, 2 : i32
    %142 = arith.index_cast %141 : i32 to index
    %c0_47 = arith.constant 0 : index
    %143 = vector.load %arg20[%142, %c0_47] : memref<16x128xf32, #tpu.memory_space<vmem>>, vector<2x128xf32>
    %cst_48 = arith.constant dense<0.000000e+00> : vector<2x128xf32>
    %144 = tpu.matmul %137, %1, %cst_48 {dimension_numbers = #tpu.dot_dimension_numbers<[1], [0], [0], [1], [0, 0, 1, 1], [], []>} : vector<2x32xf32>, vector<32x128xf32>, vector<2x128xf32> -> vector<2x128xf32>
    %145 = arith.addf %143, %144 : vector<2x128xf32>
    %146 = arith.negf %145 : vector<2x128xf32>
    %147 = math.exp %146 : vector<2x128xf32>
    %cst_49 = arith.constant 1.000000e+00 : f32
    %148 = vector.broadcast %cst_49 : f32 to vector<2x128xf32>
    %149 = arith.addf %148, %147 : vector<2x128xf32>
    %150 = arith.divf %148, %149 : vector<2x128xf32>
    %151 = vector.extract_strided_slice %150 {offsets = [0, 0], sizes = [2, 32], strides = [1, 1]} : vector<2x128xf32> to vector<2x32xf32>
    %152 = vector.extract_strided_slice %150 {offsets = [0, 32], sizes = [2, 32], strides = [1, 1]} : vector<2x128xf32> to vector<2x32xf32>
    %153 = vector.extract_strided_slice %150 {offsets = [0, 64], sizes = [2, 32], strides = [1, 1]} : vector<2x128xf32> to vector<2x32xf32>
    %cst_50 = arith.constant 2.000000e+00 : f32
    %154 = vector.broadcast %cst_50 : f32 to vector<2x32xf32>
    %155 = arith.mulf %154, %153 : vector<2x32xf32>
    %cst_51 = arith.constant 1.000000e+00 : f32
    %156 = vector.broadcast %cst_51 : f32 to vector<2x32xf32>
    %157 = arith.subf %155, %156 : vector<2x32xf32>
    %158 = vector.extract_strided_slice %150 {offsets = [0, 96], sizes = [2, 32], strides = [1, 1]} : vector<2x128xf32> to vector<2x32xf32>
    %159 = arith.mulf %152, %135 : vector<2x32xf32>
    %160 = arith.mulf %151, %157 : vector<2x32xf32>
    %161 = arith.addf %159, %160 : vector<2x32xf32>
    %162 = math.tanh %161 : vector<2x32xf32>
    %163 = arith.mulf %158, %162 : vector<2x32xf32>
    %164 = arith.index_cast %141 : i32 to index
    %c0_52 = arith.constant 0 : index
    %165 = vector.load %arg19[%164, %c0_52] : memref<16x32xf32, #tpu.memory_space<vmem>>, vector<2x32xf32>
    tpu.vector_store %arg19[%164, %c0_52], %163 {strides = array<i32>} : memref<16x32xf32, #tpu.memory_space<vmem>>, vector<2x32xf32>,
    %c6_i32 = arith.constant 6 : i32
    %c2_i32_53 = arith.constant 2 : i32
    %166 = arith.muli %c6_i32, %c2_i32_53 : i32
    %167 = tpu.assume_multiple %166, 2 : i32
    %168 = arith.index_cast %167 : i32 to index
    %c0_54 = arith.constant 0 : index
    %169 = vector.load %arg20[%168, %c0_54] : memref<16x128xf32, #tpu.memory_space<vmem>>, vector<2x128xf32>
    %cst_55 = arith.constant dense<0.000000e+00> : vector<2x128xf32>
    %170 = tpu.matmul %163, %1, %cst_55 {dimension_numbers = #tpu.dot_dimension_numbers<[1], [0], [0], [1], [0, 0, 1, 1], [], []>} : vector<2x32xf32>, vector<32x128xf32>, vector<2x128xf32> -> vector<2x128xf32>
    %171 = arith.addf %169, %170 : vector<2x128xf32>
    %172 = arith.negf %171 : vector<2x128xf32>
    %173 = math.exp %172 : vector<2x128xf32>
    %cst_56 = arith.constant 1.000000e+00 : f32
    %174 = vector.broadcast %cst_56 : f32 to vector<2x128xf32>
    %175 = arith.addf %174, %173 : vector<2x128xf32>
    %176 = arith.divf %174, %175 : vector<2x128xf32>
    %177 = vector.extract_strided_slice %176 {offsets = [0, 0], sizes = [2, 32], strides = [1, 1]} : vector<2x128xf32> to vector<2x32xf32>
    %178 = vector.extract_strided_slice %176 {offsets = [0, 32], sizes = [2, 32], strides = [1, 1]} : vector<2x128xf32> to vector<2x32xf32>
    %179 = vector.extract_strided_slice %176 {offsets = [0, 64], sizes = [2, 32], strides = [1, 1]} : vector<2x128xf32> to vector<2x32xf32>
    %cst_57 = arith.constant 2.000000e+00 : f32
    %180 = vector.broadcast %cst_57 : f32 to vector<2x32xf32>
    %181 = arith.mulf %180, %179 : vector<2x32xf32>
    %cst_58 = arith.constant 1.000000e+00 : f32
    %182 = vector.broadcast %cst_58 : f32 to vector<2x32xf32>
    %183 = arith.subf %181, %182 : vector<2x32xf32>
    %184 = vector.extract_strided_slice %176 {offsets = [0, 96], sizes = [2, 32], strides = [1, 1]} : vector<2x128xf32> to vector<2x32xf32>
    %185 = arith.mulf %178, %161 : vector<2x32xf32>
    %186 = arith.mulf %177, %183 : vector<2x32xf32>
    %187 = arith.addf %185, %186 : vector<2x32xf32>
    %188 = math.tanh %187 : vector<2x32xf32>
    %189 = arith.mulf %184, %188 : vector<2x32xf32>
    %190 = arith.index_cast %167 : i32 to index
    %c0_59 = arith.constant 0 : index
    %191 = vector.load %arg19[%190, %c0_59] : memref<16x32xf32, #tpu.memory_space<vmem>>, vector<2x32xf32>
    tpu.vector_store %arg19[%190, %c0_59], %189 {strides = array<i32>} : memref<16x32xf32, #tpu.memory_space<vmem>>, vector<2x32xf32>,
    %c7_i32 = arith.constant 7 : i32
    %c2_i32_60 = arith.constant 2 : i32
    %192 = arith.muli %c7_i32, %c2_i32_60 : i32
    %193 = tpu.assume_multiple %192, 2 : i32
    %194 = arith.index_cast %193 : i32 to index
    %c0_61 = arith.constant 0 : index
    %195 = vector.load %arg20[%194, %c0_61] : memref<16x128xf32, #tpu.memory_space<vmem>>, vector<2x128xf32>
    %cst_62 = arith.constant dense<0.000000e+00> : vector<2x128xf32>
    %196 = tpu.matmul %189, %1, %cst_62 {dimension_numbers = #tpu.dot_dimension_numbers<[1], [0], [0], [1], [0, 0, 1, 1], [], []>} : vector<2x32xf32>, vector<32x128xf32>, vector<2x128xf32> -> vector<2x128xf32>
    %197 = arith.addf %195, %196 : vector<2x128xf32>
    %198 = arith.negf %197 : vector<2x128xf32>
    %199 = math.exp %198 : vector<2x128xf32>
    %cst_63 = arith.constant 1.000000e+00 : f32
    %200 = vector.broadcast %cst_63 : f32 to vector<2x128xf32>
    %201 = arith.addf %200, %199 : vector<2x128xf32>
    %202 = arith.divf %200, %201 : vector<2x128xf32>
    %203 = vector.extract_strided_slice %202 {offsets = [0, 0], sizes = [2, 32], strides = [1, 1]} : vector<2x128xf32> to vector<2x32xf32>
    %204 = vector.extract_strided_slice %202 {offsets = [0, 32], sizes = [2, 32], strides = [1, 1]} : vector<2x128xf32> to vector<2x32xf32>
    %205 = vector.extract_strided_slice %202 {offsets = [0, 64], sizes = [2, 32], strides = [1, 1]} : vector<2x128xf32> to vector<2x32xf32>
    %cst_64 = arith.constant 2.000000e+00 : f32
    %206 = vector.broadcast %cst_64 : f32 to vector<2x32xf32>
    %207 = arith.mulf %206, %205 : vector<2x32xf32>
    %cst_65 = arith.constant 1.000000e+00 : f32
    %208 = vector.broadcast %cst_65 : f32 to vector<2x32xf32>
    %209 = arith.subf %207, %208 : vector<2x32xf32>
    %210 = vector.extract_strided_slice %202 {offsets = [0, 96], sizes = [2, 32], strides = [1, 1]} : vector<2x128xf32> to vector<2x32xf32>
    %211 = arith.mulf %204, %187 : vector<2x32xf32>
    %212 = arith.mulf %203, %209 : vector<2x32xf32>
    %213 = arith.addf %211, %212 : vector<2x32xf32>
    %214 = math.tanh %213 : vector<2x32xf32>
    %215 = arith.mulf %210, %214 : vector<2x32xf32>
    %216 = arith.index_cast %193 : i32 to index
    %c0_66 = arith.constant 0 : index
    %217 = vector.load %arg19[%216, %c0_66] : memref<16x32xf32, #tpu.memory_space<vmem>>, vector<2x32xf32>
    tpu.vector_store %arg19[%216, %c0_66], %215 {strides = array<i32>} : memref<16x32xf32, #tpu.memory_space<vmem>>, vector<2x32xf32>,
    %c8_i32 = arith.constant 8 : i32
    %c0_67 = arith.constant 0 : index
    %c0_68 = arith.constant 0 : index
    %218 = vector.load %arg4[%c0_67, %c0_68] : memref<32x128xf32, #tpu.memory_space<vmem>>, vector<32x128xf32>
    %c0_69 = arith.constant 0 : index
    %c0_70 = arith.constant 0 : index
    %219 = vector.load %arg5[%c0_69, %c0_70] : memref<32x128xf32, #tpu.memory_space<vmem>>, vector<32x128xf32>
    %c0_71 = arith.constant 0 : index
    %c0_72 = arith.constant 0 : index
    %220 = vector.load %arg6[%c0_71, %c0_72] : memref<1x128xf32, #tpu.memory_space<vmem>>, vector<1x128xf32>
    %c0_73 = arith.constant 0 : index
    %c0_74 = arith.constant 0 : index
    %221 = vector.load %arg19[%c0_73, %c0_74] : memref<16x32xf32, #tpu.memory_space<vmem>>, vector<16x32xf32>
    %cst_75 = arith.constant dense<0.000000e+00> : vector<16x128xf32>
    %222 = tpu.matmul %221, %218, %cst_75 {dimension_numbers = #tpu.dot_dimension_numbers<[1], [0], [0], [1], [0, 0, 1, 1], [], []>} : vector<16x32xf32>, vector<32x128xf32>, vector<16x128xf32> -> vector<16x128xf32>
    %223 = vector.broadcast %220 : vector<1x128xf32> to vector<16x128xf32>
    %224 = arith.addf %222, %223 : vector<16x128xf32>
    %c0_76 = arith.constant 0 : index
    %c0_77 = arith.constant 0 : index
    %225 = vector.load %arg20[%c0_76, %c0_77] : memref<16x128xf32, #tpu.memory_space<vmem>>, vector<16x128xf32>
    tpu.vector_store %arg20[%c0_76, %c0_77], %224 {strides = array<i32>} : memref<16x128xf32, #tpu.memory_space<vmem>>, vector<16x128xf32>,
    %cst_78 = arith.constant 0.000000e+00 : f32
    %226 = vector.broadcast %cst_78 : f32 to vector<2x32xf32>
    %cst_79 = arith.constant 0.000000e+00 : f32
    %227 = vector.broadcast %cst_79 : f32 to vector<2x32xf32>
    %c0_i32_80 = arith.constant 0 : i32
    %c2_i32_81 = arith.constant 2 : i32
    %228 = arith.muli %c0_i32_80, %c2_i32_81 : i32
    %229 = tpu.assume_multiple %228, 2 : i32
    %230 = arith.index_cast %229 : i32 to index
    %c0_82 = arith.constant 0 : index
    %231 = vector.load %arg20[%230, %c0_82] : memref<16x128xf32, #tpu.memory_space<vmem>>, vector<2x128xf32>
    %cst_83 = arith.constant dense<0.000000e+00> : vector<2x128xf32>
    %232 = tpu.matmul %226, %219, %cst_83 {dimension_numbers = #tpu.dot_dimension_numbers<[1], [0], [0], [1], [0, 0, 1, 1], [], []>} : vector<2x32xf32>, vector<32x128xf32>, vector<2x128xf32> -> vector<2x128xf32>
    %233 = arith.addf %231, %232 : vector<2x128xf32>
    %234 = arith.negf %233 : vector<2x128xf32>
    %235 = math.exp %234 : vector<2x128xf32>
    %cst_84 = arith.constant 1.000000e+00 : f32
    %236 = vector.broadcast %cst_84 : f32 to vector<2x128xf32>
    %237 = arith.addf %236, %235 : vector<2x128xf32>
    %238 = arith.divf %236, %237 : vector<2x128xf32>
    %239 = vector.extract_strided_slice %238 {offsets = [0, 0], sizes = [2, 32], strides = [1, 1]} : vector<2x128xf32> to vector<2x32xf32>
    %240 = vector.extract_strided_slice %238 {offsets = [0, 32], sizes = [2, 32], strides = [1, 1]} : vector<2x128xf32> to vector<2x32xf32>
    %241 = vector.extract_strided_slice %238 {offsets = [0, 64], sizes = [2, 32], strides = [1, 1]} : vector<2x128xf32> to vector<2x32xf32>
    %cst_85 = arith.constant 2.000000e+00 : f32
    %242 = vector.broadcast %cst_85 : f32 to vector<2x32xf32>
    %243 = arith.mulf %242, %241 : vector<2x32xf32>
    %cst_86 = arith.constant 1.000000e+00 : f32
    %244 = vector.broadcast %cst_86 : f32 to vector<2x32xf32>
    %245 = arith.subf %243, %244 : vector<2x32xf32>
    %246 = vector.extract_strided_slice %238 {offsets = [0, 96], sizes = [2, 32], strides = [1, 1]} : vector<2x128xf32> to vector<2x32xf32>
    %247 = arith.mulf %240, %227 : vector<2x32xf32>
    %248 = arith.mulf %239, %245 : vector<2x32xf32>
    %249 = arith.addf %247, %248 : vector<2x32xf32>
    %250 = math.tanh %249 : vector<2x32xf32>
    %251 = arith.mulf %246, %250 : vector<2x32xf32>
    %252 = arith.index_cast %229 : i32 to index
    %c0_87 = arith.constant 0 : index
    %253 = vector.load %arg19[%252, %c0_87] : memref<16x32xf32, #tpu.memory_space<vmem>>, vector<2x32xf32>
    tpu.vector_store %arg19[%252, %c0_87], %251 {strides = array<i32>} : memref<16x32xf32, #tpu.memory_space<vmem>>, vector<2x32xf32>,
    %c1_i32_88 = arith.constant 1 : i32
    %c2_i32_89 = arith.constant 2 : i32
    %254 = arith.muli %c1_i32_88, %c2_i32_89 : i32
    %255 = tpu.assume_multiple %254, 2 : i32
    %256 = arith.index_cast %255 : i32 to index
    %c0_90 = arith.constant 0 : index
    %257 = vector.load %arg20[%256, %c0_90] : memref<16x128xf32, #tpu.memory_space<vmem>>, vector<2x128xf32>
    %cst_91 = arith.constant dense<0.000000e+00> : vector<2x128xf32>
    %258 = tpu.matmul %251, %219, %cst_91 {dimension_numbers = #tpu.dot_dimension_numbers<[1], [0], [0], [1], [0, 0, 1, 1], [], []>} : vector<2x32xf32>, vector<32x128xf32>, vector<2x128xf32> -> vector<2x128xf32>
    %259 = arith.addf %257, %258 : vector<2x128xf32>
    %260 = arith.negf %259 : vector<2x128xf32>
    %261 = math.exp %260 : vector<2x128xf32>
    %cst_92 = arith.constant 1.000000e+00 : f32
    %262 = vector.broadcast %cst_92 : f32 to vector<2x128xf32>
    %263 = arith.addf %262, %261 : vector<2x128xf32>
    %264 = arith.divf %262, %263 : vector<2x128xf32>
    %265 = vector.extract_strided_slice %264 {offsets = [0, 0], sizes = [2, 32], strides = [1, 1]} : vector<2x128xf32> to vector<2x32xf32>
    %266 = vector.extract_strided_slice %264 {offsets = [0, 32], sizes = [2, 32], strides = [1, 1]} : vector<2x128xf32> to vector<2x32xf32>
    %267 = vector.extract_strided_slice %264 {offsets = [0, 64], sizes = [2, 32], strides = [1, 1]} : vector<2x128xf32> to vector<2x32xf32>
    %cst_93 = arith.constant 2.000000e+00 : f32
    %268 = vector.broadcast %cst_93 : f32 to vector<2x32xf32>
    %269 = arith.mulf %268, %267 : vector<2x32xf32>
    %cst_94 = arith.constant 1.000000e+00 : f32
    %270 = vector.broadcast %cst_94 : f32 to vector<2x32xf32>
    %271 = arith.subf %269, %270 : vector<2x32xf32>
    %272 = vector.extract_strided_slice %264 {offsets = [0, 96], sizes = [2, 32], strides = [1, 1]} : vector<2x128xf32> to vector<2x32xf32>
    %273 = arith.mulf %266, %249 : vector<2x32xf32>
    %274 = arith.mulf %265, %271 : vector<2x32xf32>
    %275 = arith.addf %273, %274 : vector<2x32xf32>
    %276 = math.tanh %275 : vector<2x32xf32>
    %277 = arith.mulf %272, %276 : vector<2x32xf32>
    %278 = arith.index_cast %255 : i32 to index
    %c0_95 = arith.constant 0 : index
    %279 = vector.load %arg19[%278, %c0_95] : memref<16x32xf32, #tpu.memory_space<vmem>>, vector<2x32xf32>
    tpu.vector_store %arg19[%278, %c0_95], %277 {strides = array<i32>} : memref<16x32xf32, #tpu.memory_space<vmem>>, vector<2x32xf32>,
    %c2_i32_96 = arith.constant 2 : i32
    %c2_i32_97 = arith.constant 2 : i32
    %280 = arith.muli %c2_i32_96, %c2_i32_97 : i32
    %281 = tpu.assume_multiple %280, 2 : i32
    %282 = arith.index_cast %281 : i32 to index
    %c0_98 = arith.constant 0 : index
    %283 = vector.load %arg20[%282, %c0_98] : memref<16x128xf32, #tpu.memory_space<vmem>>, vector<2x128xf32>
    %cst_99 = arith.constant dense<0.000000e+00> : vector<2x128xf32>
    %284 = tpu.matmul %277, %219, %cst_99 {dimension_numbers = #tpu.dot_dimension_numbers<[1], [0], [0], [1], [0, 0, 1, 1], [], []>} : vector<2x32xf32>, vector<32x128xf32>, vector<2x128xf32> -> vector<2x128xf32>
    %285 = arith.addf %283, %284 : vector<2x128xf32>
    %286 = arith.negf %285 : vector<2x128xf32>
    %287 = math.exp %286 : vector<2x128xf32>
    %cst_100 = arith.constant 1.000000e+00 : f32
    %288 = vector.broadcast %cst_100 : f32 to vector<2x128xf32>
    %289 = arith.addf %288, %287 : vector<2x128xf32>
    %290 = arith.divf %288, %289 : vector<2x128xf32>
    %291 = vector.extract_strided_slice %290 {offsets = [0, 0], sizes = [2, 32], strides = [1, 1]} : vector<2x128xf32> to vector<2x32xf32>
    %292 = vector.extract_strided_slice %290 {offsets = [0, 32], sizes = [2, 32], strides = [1, 1]} : vector<2x128xf32> to vector<2x32xf32>
    %293 = vector.extract_strided_slice %290 {offsets = [0, 64], sizes = [2, 32], strides = [1, 1]} : vector<2x128xf32> to vector<2x32xf32>
    %cst_101 = arith.constant 2.000000e+00 : f32
    %294 = vector.broadcast %cst_101 : f32 to vector<2x32xf32>
    %295 = arith.mulf %294, %293 : vector<2x32xf32>
    %cst_102 = arith.constant 1.000000e+00 : f32
    %296 = vector.broadcast %cst_102 : f32 to vector<2x32xf32>
    %297 = arith.subf %295, %296 : vector<2x32xf32>
    %298 = vector.extract_strided_slice %290 {offsets = [0, 96], sizes = [2, 32], strides = [1, 1]} : vector<2x128xf32> to vector<2x32xf32>
    %299 = arith.mulf %292, %275 : vector<2x32xf32>
    %300 = arith.mulf %291, %297 : vector<2x32xf32>
    %301 = arith.addf %299, %300 : vector<2x32xf32>
    %302 = math.tanh %301 : vector<2x32xf32>
    %303 = arith.mulf %298, %302 : vector<2x32xf32>
    %304 = arith.index_cast %281 : i32 to index
    %c0_103 = arith.constant 0 : index
    %305 = vector.load %arg19[%304, %c0_103] : memref<16x32xf32, #tpu.memory_space<vmem>>, vector<2x32xf32>
    tpu.vector_store %arg19[%304, %c0_103], %303 {strides = array<i32>} : memref<16x32xf32, #tpu.memory_space<vmem>>, vector<2x32xf32>,
    %c3_i32_104 = arith.constant 3 : i32
    %c2_i32_105 = arith.constant 2 : i32
    %306 = arith.muli %c3_i32_104, %c2_i32_105 : i32
    %307 = tpu.assume_multiple %306, 2 : i32
    %308 = arith.index_cast %307 : i32 to index
    %c0_106 = arith.constant 0 : index
    %309 = vector.load %arg20[%308, %c0_106] : memref<16x128xf32, #tpu.memory_space<vmem>>, vector<2x128xf32>
    %cst_107 = arith.constant dense<0.000000e+00> : vector<2x128xf32>
    %310 = tpu.matmul %303, %219, %cst_107 {dimension_numbers = #tpu.dot_dimension_numbers<[1], [0], [0], [1], [0, 0, 1, 1], [], []>} : vector<2x32xf32>, vector<32x128xf32>, vector<2x128xf32> -> vector<2x128xf32>
    %311 = arith.addf %309, %310 : vector<2x128xf32>
    %312 = arith.negf %311 : vector<2x128xf32>
    %313 = math.exp %312 : vector<2x128xf32>
    %cst_108 = arith.constant 1.000000e+00 : f32
    %314 = vector.broadcast %cst_108 : f32 to vector<2x128xf32>
    %315 = arith.addf %314, %313 : vector<2x128xf32>
    %316 = arith.divf %314, %315 : vector<2x128xf32>
    %317 = vector.extract_strided_slice %316 {offsets = [0, 0], sizes = [2, 32], strides = [1, 1]} : vector<2x128xf32> to vector<2x32xf32>
    %318 = vector.extract_strided_slice %316 {offsets = [0, 32], sizes = [2, 32], strides = [1, 1]} : vector<2x128xf32> to vector<2x32xf32>
    %319 = vector.extract_strided_slice %316 {offsets = [0, 64], sizes = [2, 32], strides = [1, 1]} : vector<2x128xf32> to vector<2x32xf32>
    %cst_109 = arith.constant 2.000000e+00 : f32
    %320 = vector.broadcast %cst_109 : f32 to vector<2x32xf32>
    %321 = arith.mulf %320, %319 : vector<2x32xf32>
    %cst_110 = arith.constant 1.000000e+00 : f32
    %322 = vector.broadcast %cst_110 : f32 to vector<2x32xf32>
    %323 = arith.subf %321, %322 : vector<2x32xf32>
    %324 = vector.extract_strided_slice %316 {offsets = [0, 96], sizes = [2, 32], strides = [1, 1]} : vector<2x128xf32> to vector<2x32xf32>
    %325 = arith.mulf %318, %301 : vector<2x32xf32>
    %326 = arith.mulf %317, %323 : vector<2x32xf32>
    %327 = arith.addf %325, %326 : vector<2x32xf32>
    %328 = math.tanh %327 : vector<2x32xf32>
    %329 = arith.mulf %324, %328 : vector<2x32xf32>
    %330 = arith.index_cast %307 : i32 to index
    %c0_111 = arith.constant 0 : index
    %331 = vector.load %arg19[%330, %c0_111] : memref<16x32xf32, #tpu.memory_space<vmem>>, vector<2x32xf32>
    tpu.vector_store %arg19[%330, %c0_111], %329 {strides = array<i32>} : memref<16x32xf32, #tpu.memory_space<vmem>>, vector<2x32xf32>,
    %c4_i32_112 = arith.constant 4 : i32
    %c2_i32_113 = arith.constant 2 : i32
    %332 = arith.muli %c4_i32_112, %c2_i32_113 : i32
    %333 = tpu.assume_multiple %332, 2 : i32
    %334 = arith.index_cast %333 : i32 to index
    %c0_114 = arith.constant 0 : index
    %335 = vector.load %arg20[%334, %c0_114] : memref<16x128xf32, #tpu.memory_space<vmem>>, vector<2x128xf32>
    %cst_115 = arith.constant dense<0.000000e+00> : vector<2x128xf32>
    %336 = tpu.matmul %329, %219, %cst_115 {dimension_numbers = #tpu.dot_dimension_numbers<[1], [0], [0], [1], [0, 0, 1, 1], [], []>} : vector<2x32xf32>, vector<32x128xf32>, vector<2x128xf32> -> vector<2x128xf32>
    %337 = arith.addf %335, %336 : vector<2x128xf32>
    %338 = arith.negf %337 : vector<2x128xf32>
    %339 = math.exp %338 : vector<2x128xf32>
    %cst_116 = arith.constant 1.000000e+00 : f32
    %340 = vector.broadcast %cst_116 : f32 to vector<2x128xf32>
    %341 = arith.addf %340, %339 : vector<2x128xf32>
    %342 = arith.divf %340, %341 : vector<2x128xf32>
    %343 = vector.extract_strided_slice %342 {offsets = [0, 0], sizes = [2, 32], strides = [1, 1]} : vector<2x128xf32> to vector<2x32xf32>
    %344 = vector.extract_strided_slice %342 {offsets = [0, 32], sizes = [2, 32], strides = [1, 1]} : vector<2x128xf32> to vector<2x32xf32>
    %345 = vector.extract_strided_slice %342 {offsets = [0, 64], sizes = [2, 32], strides = [1, 1]} : vector<2x128xf32> to vector<2x32xf32>
    %cst_117 = arith.constant 2.000000e+00 : f32
    %346 = vector.broadcast %cst_117 : f32 to vector<2x32xf32>
    %347 = arith.mulf %346, %345 : vector<2x32xf32>
    %cst_118 = arith.constant 1.000000e+00 : f32
    %348 = vector.broadcast %cst_118 : f32 to vector<2x32xf32>
    %349 = arith.subf %347, %348 : vector<2x32xf32>
    %350 = vector.extract_strided_slice %342 {offsets = [0, 96], sizes = [2, 32], strides = [1, 1]} : vector<2x128xf32> to vector<2x32xf32>
    %351 = arith.mulf %344, %327 : vector<2x32xf32>
    %352 = arith.mulf %343, %349 : vector<2x32xf32>
    %353 = arith.addf %351, %352 : vector<2x32xf32>
    %354 = math.tanh %353 : vector<2x32xf32>
    %355 = arith.mulf %350, %354 : vector<2x32xf32>
    %356 = arith.index_cast %333 : i32 to index
    %c0_119 = arith.constant 0 : index
    %357 = vector.load %arg19[%356, %c0_119] : memref<16x32xf32, #tpu.memory_space<vmem>>, vector<2x32xf32>
    tpu.vector_store %arg19[%356, %c0_119], %355 {strides = array<i32>} : memref<16x32xf32, #tpu.memory_space<vmem>>, vector<2x32xf32>,
    %c5_i32_120 = arith.constant 5 : i32
    %c2_i32_121 = arith.constant 2 : i32
    %358 = arith.muli %c5_i32_120, %c2_i32_121 : i32
    %359 = tpu.assume_multiple %358, 2 : i32
    %360 = arith.index_cast %359 : i32 to index
    %c0_122 = arith.constant 0 : index
    %361 = vector.load %arg20[%360, %c0_122] : memref<16x128xf32, #tpu.memory_space<vmem>>, vector<2x128xf32>
    %cst_123 = arith.constant dense<0.000000e+00> : vector<2x128xf32>
    %362 = tpu.matmul %355, %219, %cst_123 {dimension_numbers = #tpu.dot_dimension_numbers<[1], [0], [0], [1], [0, 0, 1, 1], [], []>} : vector<2x32xf32>, vector<32x128xf32>, vector<2x128xf32> -> vector<2x128xf32>
    %363 = arith.addf %361, %362 : vector<2x128xf32>
    %364 = arith.negf %363 : vector<2x128xf32>
    %365 = math.exp %364 : vector<2x128xf32>
    %cst_124 = arith.constant 1.000000e+00 : f32
    %366 = vector.broadcast %cst_124 : f32 to vector<2x128xf32>
    %367 = arith.addf %366, %365 : vector<2x128xf32>
    %368 = arith.divf %366, %367 : vector<2x128xf32>
    %369 = vector.extract_strided_slice %368 {offsets = [0, 0], sizes = [2, 32], strides = [1, 1]} : vector<2x128xf32> to vector<2x32xf32>
    %370 = vector.extract_strided_slice %368 {offsets = [0, 32], sizes = [2, 32], strides = [1, 1]} : vector<2x128xf32> to vector<2x32xf32>
    %371 = vector.extract_strided_slice %368 {offsets = [0, 64], sizes = [2, 32], strides = [1, 1]} : vector<2x128xf32> to vector<2x32xf32>
    %cst_125 = arith.constant 2.000000e+00 : f32
    %372 = vector.broadcast %cst_125 : f32 to vector<2x32xf32>
    %373 = arith.mulf %372, %371 : vector<2x32xf32>
    %cst_126 = arith.constant 1.000000e+00 : f32
    %374 = vector.broadcast %cst_126 : f32 to vector<2x32xf32>
    %375 = arith.subf %373, %374 : vector<2x32xf32>
    %376 = vector.extract_strided_slice %368 {offsets = [0, 96], sizes = [2, 32], strides = [1, 1]} : vector<2x128xf32> to vector<2x32xf32>
    %377 = arith.mulf %370, %353 : vector<2x32xf32>
    %378 = arith.mulf %369, %375 : vector<2x32xf32>
    %379 = arith.addf %377, %378 : vector<2x32xf32>
    %380 = math.tanh %379 : vector<2x32xf32>
    %381 = arith.mulf %376, %380 : vector<2x32xf32>
    %382 = arith.index_cast %359 : i32 to index
    %c0_127 = arith.constant 0 : index
    %383 = vector.load %arg19[%382, %c0_127] : memref<16x32xf32, #tpu.memory_space<vmem>>, vector<2x32xf32>
    tpu.vector_store %arg19[%382, %c0_127], %381 {strides = array<i32>} : memref<16x32xf32, #tpu.memory_space<vmem>>, vector<2x32xf32>,
    %c6_i32_128 = arith.constant 6 : i32
    %c2_i32_129 = arith.constant 2 : i32
    %384 = arith.muli %c6_i32_128, %c2_i32_129 : i32
    %385 = tpu.assume_multiple %384, 2 : i32
    %386 = arith.index_cast %385 : i32 to index
    %c0_130 = arith.constant 0 : index
    %387 = vector.load %arg20[%386, %c0_130] : memref<16x128xf32, #tpu.memory_space<vmem>>, vector<2x128xf32>
    %cst_131 = arith.constant dense<0.000000e+00> : vector<2x128xf32>
    %388 = tpu.matmul %381, %219, %cst_131 {dimension_numbers = #tpu.dot_dimension_numbers<[1], [0], [0], [1], [0, 0, 1, 1], [], []>} : vector<2x32xf32>, vector<32x128xf32>, vector<2x128xf32> -> vector<2x128xf32>
    %389 = arith.addf %387, %388 : vector<2x128xf32>
    %390 = arith.negf %389 : vector<2x128xf32>
    %391 = math.exp %390 : vector<2x128xf32>
    %cst_132 = arith.constant 1.000000e+00 : f32
    %392 = vector.broadcast %cst_132 : f32 to vector<2x128xf32>
    %393 = arith.addf %392, %391 : vector<2x128xf32>
    %394 = arith.divf %392, %393 : vector<2x128xf32>
    %395 = vector.extract_strided_slice %394 {offsets = [0, 0], sizes = [2, 32], strides = [1, 1]} : vector<2x128xf32> to vector<2x32xf32>
    %396 = vector.extract_strided_slice %394 {offsets = [0, 32], sizes = [2, 32], strides = [1, 1]} : vector<2x128xf32> to vector<2x32xf32>
    %397 = vector.extract_strided_slice %394 {offsets = [0, 64], sizes = [2, 32], strides = [1, 1]} : vector<2x128xf32> to vector<2x32xf32>
    %cst_133 = arith.constant 2.000000e+00 : f32
    %398 = vector.broadcast %cst_133 : f32 to vector<2x32xf32>
    %399 = arith.mulf %398, %397 : vector<2x32xf32>
    %cst_134 = arith.constant 1.000000e+00 : f32
    %400 = vector.broadcast %cst_134 : f32 to vector<2x32xf32>
    %401 = arith.subf %399, %400 : vector<2x32xf32>
    %402 = vector.extract_strided_slice %394 {offsets = [0, 96], sizes = [2, 32], strides = [1, 1]} : vector<2x128xf32> to vector<2x32xf32>
    %403 = arith.mulf %396, %379 : vector<2x32xf32>
    %404 = arith.mulf %395, %401 : vector<2x32xf32>
    %405 = arith.addf %403, %404 : vector<2x32xf32>
    %406 = math.tanh %405 : vector<2x32xf32>
    %407 = arith.mulf %402, %406 : vector<2x32xf32>
    %408 = arith.index_cast %385 : i32 to index
    %c0_135 = arith.constant 0 : index
    %409 = vector.load %arg19[%408, %c0_135] : memref<16x32xf32, #tpu.memory_space<vmem>>, vector<2x32xf32>
    tpu.vector_store %arg19[%408, %c0_135], %407 {strides = array<i32>} : memref<16x32xf32, #tpu.memory_space<vmem>>, vector<2x32xf32>,
    %c7_i32_136 = arith.constant 7 : i32
    %c2_i32_137 = arith.constant 2 : i32
    %410 = arith.muli %c7_i32_136, %c2_i32_137 : i32
    %411 = tpu.assume_multiple %410, 2 : i32
    %412 = arith.index_cast %411 : i32 to index
    %c0_138 = arith.constant 0 : index
    %413 = vector.load %arg20[%412, %c0_138] : memref<16x128xf32, #tpu.memory_space<vmem>>, vector<2x128xf32>
    %cst_139 = arith.constant dense<0.000000e+00> : vector<2x128xf32>
    %414 = tpu.matmul %407, %219, %cst_139 {dimension_numbers = #tpu.dot_dimension_numbers<[1], [0], [0], [1], [0, 0, 1, 1], [], []>} : vector<2x32xf32>, vector<32x128xf32>, vector<2x128xf32> -> vector<2x128xf32>
    %415 = arith.addf %413, %414 : vector<2x128xf32>
    %416 = arith.negf %415 : vector<2x128xf32>
    %417 = math.exp %416 : vector<2x128xf32>
    %cst_140 = arith.constant 1.000000e+00 : f32
    %418 = vector.broadcast %cst_140 : f32 to vector<2x128xf32>
    %419 = arith.addf %418, %417 : vector<2x128xf32>
    %420 = arith.divf %418, %419 : vector<2x128xf32>
    %421 = vector.extract_strided_slice %420 {offsets = [0, 0], sizes = [2, 32], strides = [1, 1]} : vector<2x128xf32> to vector<2x32xf32>
    %422 = vector.extract_strided_slice %420 {offsets = [0, 32], sizes = [2, 32], strides = [1, 1]} : vector<2x128xf32> to vector<2x32xf32>
    %423 = vector.extract_strided_slice %420 {offsets = [0, 64], sizes = [2, 32], strides = [1, 1]} : vector<2x128xf32> to vector<2x32xf32>
    %cst_141 = arith.constant 2.000000e+00 : f32
    %424 = vector.broadcast %cst_141 : f32 to vector<2x32xf32>
    %425 = arith.mulf %424, %423 : vector<2x32xf32>
    %cst_142 = arith.constant 1.000000e+00 : f32
    %426 = vector.broadcast %cst_142 : f32 to vector<2x32xf32>
    %427 = arith.subf %425, %426 : vector<2x32xf32>
    %428 = vector.extract_strided_slice %420 {offsets = [0, 96], sizes = [2, 32], strides = [1, 1]} : vector<2x128xf32> to vector<2x32xf32>
    %429 = arith.mulf %422, %405 : vector<2x32xf32>
    %430 = arith.mulf %421, %427 : vector<2x32xf32>
    %431 = arith.addf %429, %430 : vector<2x32xf32>
    %432 = math.tanh %431 : vector<2x32xf32>
    %433 = arith.mulf %428, %432 : vector<2x32xf32>
    %434 = arith.index_cast %411 : i32 to index
    %c0_143 = arith.constant 0 : index
    %435 = vector.load %arg19[%434, %c0_143] : memref<16x32xf32, #tpu.memory_space<vmem>>, vector<2x32xf32>
    tpu.vector_store %arg19[%434, %c0_143], %433 {strides = array<i32>} : memref<16x32xf32, #tpu.memory_space<vmem>>, vector<2x32xf32>,
    %c8_i32_144 = arith.constant 8 : i32
    %c0_145 = arith.constant 0 : index
    %c0_146 = arith.constant 0 : index
    %436 = vector.load %arg19[%c0_145, %c0_146] : memref<16x32xf32, #tpu.memory_space<vmem>>, vector<16x32xf32>
    %cst_147 = arith.constant 0.000000e+00 : f32
    %437 = vector.broadcast %cst_147 : f32 to vector<16x32xf32>
    %438 = arith.maximumf %436, %437 : vector<16x32xf32>
    %c0_148 = arith.constant 0 : index
    %c0_149 = arith.constant 0 : index
    %439 = vector.load %arg7[%c0_148, %c0_149] : memref<32x32xf32, #tpu.memory_space<vmem>>, vector<32x32xf32>
    %cst_150 = arith.constant dense<0.000000e+00> : vector<16x32xf32>
    %440 = tpu.matmul %438, %439, %cst_150 {dimension_numbers = #tpu.dot_dimension_numbers<[1], [0], [0], [1], [0, 0, 1, 1], [], []>} : vector<16x32xf32>, vector<32x32xf32>, vector<16x32xf32> -> vector<16x32xf32>
    %c0_151 = arith.constant 0 : index
    %c0_152 = arith.constant 0 : index
    %441 = vector.load %arg8[%c0_151, %c0_152] : memref<1x32xf32, #tpu.memory_space<vmem>>, vector<1x32xf32>
    %442 = vector.broadcast %441 : vector<1x32xf32> to vector<16x32xf32>
    %443 = arith.addf %440, %442 : vector<16x32xf32>
    %cst_153 = arith.constant 0.000000e+00 : f32
    %444 = vector.broadcast %cst_153 : f32 to vector<16x32xf32>
    %445 = arith.maximumf %443, %444 : vector<16x32xf32>
    %c0_154 = arith.constant 0 : index
    %c0_155 = arith.constant 0 : index
    %446 = vector.load %arg9[%c0_154, %c0_155] : memref<32x32xf32, #tpu.memory_space<vmem>>, vector<32x32xf32>
    %cst_156 = arith.constant dense<0.000000e+00> : vector<16x32xf32>
    %447 = tpu.matmul %445, %446, %cst_156 {dimension_numbers = #tpu.dot_dimension_numbers<[1], [0], [0], [1], [0, 0, 1, 1], [], []>} : vector<16x32xf32>, vector<32x32xf32>, vector<16x32xf32> -> vector<16x32xf32>
    %c0_157 = arith.constant 0 : index
    %c0_158 = arith.constant 0 : index
    %448 = vector.load %arg10[%c0_157, %c0_158] : memref<1x32xf32, #tpu.memory_space<vmem>>, vector<1x32xf32>
    %449 = vector.broadcast %448 : vector<1x32xf32> to vector<16x32xf32>
    %450 = arith.addf %447, %449 : vector<16x32xf32>
    %c0_159 = arith.constant 0 : index
    %c0_160 = arith.constant 0 : index
    %451 = vector.load %arg11[%c0_159, %c0_160] : memref<32x4xf32, #tpu.memory_space<vmem>>, vector<32x4xf32>
    %cst_161 = arith.constant dense<0.000000e+00> : vector<16x4xf32>
    %452 = tpu.matmul %450, %451, %cst_161 {dimension_numbers = #tpu.dot_dimension_numbers<[1], [0], [0], [1], [0, 0, 1, 1], [], []>} : vector<16x32xf32>, vector<32x4xf32>, vector<16x4xf32> -> vector<16x4xf32>
    %c0_162 = arith.constant 0 : index
    %c0_163 = arith.constant 0 : index
    %453 = vector.load %arg12[%c0_162, %c0_163] : memref<1x4xf32, #tpu.memory_space<vmem>>, vector<1x4xf32>
    %454 = vector.broadcast %453 : vector<1x4xf32> to vector<16x4xf32>
    %455 = arith.addf %452, %454 : vector<16x4xf32>
    %c0_164 = arith.constant 0 : index
    %c0_165 = arith.constant 0 : index
    %456 = vector.load %arg13[%c0_164, %c0_165] : memref<32x32xf32, #tpu.memory_space<vmem>>, vector<32x32xf32>
    %cst_166 = arith.constant dense<0.000000e+00> : vector<16x32xf32>
    %457 = tpu.matmul %436, %456, %cst_166 {dimension_numbers = #tpu.dot_dimension_numbers<[1], [0], [0], [1], [0, 0, 1, 1], [], []>} : vector<16x32xf32>, vector<32x32xf32>, vector<16x32xf32> -> vector<16x32xf32>
    %c0_167 = arith.constant 0 : index
    %c0_168 = arith.constant 0 : index
    %458 = vector.load %arg14[%c0_167, %c0_168] : memref<1x32xf32, #tpu.memory_space<vmem>>, vector<1x32xf32>
    %459 = vector.broadcast %458 : vector<1x32xf32> to vector<16x32xf32>
    %460 = arith.addf %457, %459 : vector<16x32xf32>
    %cst_169 = arith.constant 0.000000e+00 : f32
    %461 = vector.broadcast %cst_169 : f32 to vector<16x32xf32>
    %462 = arith.maximumf %460, %461 : vector<16x32xf32>
    %c0_170 = arith.constant 0 : index
    %c0_171 = arith.constant 0 : index
    %463 = vector.load %arg15[%c0_170, %c0_171] : memref<32x1xf32, #tpu.memory_space<vmem>>, vector<32x1xf32>
    %cst_172 = arith.constant dense<0.000000e+00> : vector<16x1xf32>
    %464 = tpu.matmul %462, %463, %cst_172 {dimension_numbers = #tpu.dot_dimension_numbers<[1], [0], [0], [1], [0, 0, 1, 1], [], []>} : vector<16x32xf32>, vector<32x1xf32>, vector<16x1xf32> -> vector<16x1xf32>
    %c0_173 = arith.constant 0 : index
    %c0_174 = arith.constant 0 : index
    %465 = vector.load %arg16[%c0_173, %c0_174] : memref<1x1xf32, #tpu.memory_space<vmem>>, vector<1x1xf32>
    %466 = vector.broadcast %465 : vector<1x1xf32> to vector<16x1xf32>
    %467 = arith.addf %464, %466 : vector<16x1xf32>
    %cst_175 = arith.constant dense<0xFF800000> : vector<1xf32>
    %468 = vector.multi_reduction <maximumf>, %467, %cst_175 [0] : vector<16x1xf32> to vector<1xf32>
    %469 = vector.shape_cast %468 : vector<1xf32> to vector<1x1xf32>
    %470 = vector.broadcast %469 : vector<1x1xf32> to vector<16x1xf32>
    %471 = arith.subf %467, %470 : vector<16x1xf32>
    %472 = math.exp %471 : vector<16x1xf32>
    %cst_176 = arith.constant dense<0.000000e+00> : vector<1xf32>
    %473 = vector.multi_reduction <add>, %472, %cst_176 [0] : vector<16x1xf32> to vector<1xf32>
    %474 = vector.shape_cast %473 : vector<1xf32> to vector<1x1xf32>
    %475 = tpu.reciprocal %474 {approx = true} : vector<1x1xf32> -> vector<1x1xf32>
    %476 = vector.broadcast %475 : vector<1x1xf32> to vector<16x1xf32>
    %477 = arith.mulf %472, %476 : vector<16x1xf32>
    %478 = vector.broadcast %477 : vector<16x1xf32> to vector<16x4xf32>
    %479 = arith.mulf %455, %478 : vector<16x4xf32>
    %cst_177 = arith.constant dense<0.000000e+00> : vector<4xf32>
    %480 = vector.multi_reduction <add>, %479, %cst_177 [0] : vector<16x4xf32> to vector<4xf32>
    %481 = vector.shape_cast %480 : vector<4xf32> to vector<1x4xf32>
    %c0_178 = arith.constant 0 : index
    %c0_179 = arith.constant 0 : index
    %482 = vector.load %arg17[%c0_178, %c0_179] : memref<1x4xf32, #tpu.memory_space<vmem>>, vector<1x4xf32>
    tpu.vector_store %arg17[%c0_178, %c0_179], %481 {strides = array<i32>} : memref<1x4xf32, #tpu.memory_space<vmem>>, vector<1x4xf32>,
    %483 = tpu.iota {dimensions = array<i32: 0>} : vector<16x16xi32>
    %484 = tpu.iota {dimensions = array<i32: 1>} : vector<16x16xi32>
    %485 = arith.cmpi eq, %483, %484 : vector<16x16xi32>
    %cst_180 = arith.constant 0.000000e+00 : f32
    %486 = vector.shape_cast %477 : vector<16x1xf32> to vector<16x1xf32>
    %487 = vector.broadcast %486 : vector<16x1xf32> to vector<16x16xf32>
    %488 = vector.broadcast %cst_180 : f32 to vector<16x16xf32>
    %489 = arith.select %485, %487, %488 : vector<16x16xi1>, vector<16x16xf32>
    %cst_181 = arith.constant dense<0.000000e+00> : vector<16xf32>
    %490 = vector.multi_reduction <add>, %489, %cst_181 [0] : vector<16x16xf32> to vector<16xf32>
    %491 = vector.shape_cast %490 : vector<16xf32> to vector<1x16xf32>
    %c0_182 = arith.constant 0 : index
    %c0_183 = arith.constant 0 : index
    %492 = vector.load %arg18[%c0_182, %c0_183] : memref<1x16xf32, #tpu.memory_space<vmem>>, vector<1x16xf32>
    tpu.vector_store %arg18[%c0_182, %c0_183], %491 {strides = array<i32>} : memref<1x16xf32, #tpu.memory_space<vmem>>, vector<1x16xf32>,
    return
  }
}

</mosaic_0001>

<bundles_post_ra>
// kernel: lstm_ann_forward.1
= control target key start
LH: loop header
LB: loop body
LE: loop exit
PB: predicated region body
PF: predicated region fallthrough
CT: control target
= control target key end

     0   :  { %s4000_s0 = inlined_call_operand.vmem [shape: f32[16,16], index: 0, kind: input, shape index: {}]   ;;  %s4001_s1 = inlined_call_operand.vmem [shape: f32[16,128], index: 1, kind: input, shape index: {}]   ;;  %s4002_s2 = inlined_call_operand.vmem [shape: f32[32,128], index: 2, kind: input, shape index: {}]   ;;  %s4003_s3 = inlined_call_operand.vmem [shape: f32[1,128], index: 3, kind: input, shape index: {}]   ;;  %s4004_s4 = inlined_call_operand.vmem [shape: f32[32,128], index: 4, kind: input, shape index: {}]   ;;  %s4005_s5 = inlined_call_operand.vmem [shape: f32[32,128], index: 5, kind: input, shape index: {}]   ;;  %s4006_s6 = inlined_call_operand.hbm [shape: f32[1,128], index: 6, kind: input, shape index: {}]   ;;  %s4007_s7 = inlined_call_operand.hbm [shape: f32[32,32], index: 7, kind: input, shape index: {}]   ;;  %s4008_s8 = inlined_call_operand.hbm [shape: f32[1,32], index: 8, kind: input, shape index: {}]   ;;  %s4009_s9 = inlined_call_operand.hbm [shape: f32[32,32], index: 9, kind: input, shape index: {}]   ;;  %s4010_s10 = inlined_call_operand.hbm [shape: f32[1,32], index: 10, kind: input, shape index: {}]   ;;  %s4011_s11 = inlined_call_operand.vmem [shape: f32[32,4], index: 11, kind: input, shape index: {}]   ;;  %s4012_s12 = inlined_call_operand.hbm [shape: f32[1,4], index: 12, kind: input, shape index: {}]   ;;  %s4013_s13 = inlined_call_operand.vmem [shape: f32[32,32], index: 13, kind: input, shape index: {}]   ;;  %s4014_s14 = inlined_call_operand.hbm [shape: f32[1,32], index: 14, kind: input, shape index: {}]   ;;  %s4015_s15 = inlined_call_operand.vmem [shape: f32[32,1], index: 15, kind: input, shape index: {}]   ;;  %s4016_s16 = inlined_call_operand.<no memory space> [shape: f32[1,1], index: 16, kind: input, shape index: {}]   ;;  %s4017_s17 = inlined_call_operand.hbm [shape: f32[1,4], index: 17, kind: output, shape index: {0}]   ;;  %s4018_s18 = inlined_call_operand.vmem [shape: f32[1,16], index: 18, kind: output, shape index: {1}]  }
   0x1   :  { %4022 = sst [smem:[#allocation23_spill]] %s4000_s0  ;;  %v24_v0 = vstv %s4016_s16 }
   0x2   :  { %4023 = sst [smem:[#allocation24_spill]] %s4001_s1  ;;  %25 = vst [vmem:[#allocation4] sm:$0x1] %v24_v0 }
   0x3   :  { %4024 = sst [smem:[#allocation25_spill]] %s4002_s2 }
   0x4   :  { %26 = vsyncpa [#allocation6], 0 }
   0x5   :  { %27 = vsyncpa [#allocation9], 0 }
   0x6   :  { %28 = vsyncpa [#allocation12], 0 }
   0x7   :  { %29 = vsyncpa [#allocation15], 0 }
   0x8   :  { %30 = vsyncpa [#allocation7], 0  ;;  %s3476_s29 = smov [#allocation8]   ;;  %s3290_s1 = scalar_lea.hbm %s4007_s7, 512 }
   0x9   :  { %s58_s30 = sshll.u32 %s3476_s29, 4  ;;  %p3291_p0 = scmp.ne.s32.totalorder %s4007_s7, %s3290_s1  ;;  %s59_s30 = int_to_ptr.vmem [resolvable:$true] %s58_s30 }
   0xa   :  { %p3294_p1 = scmp.lt.u32.totalorder %s3290_s1, %s4007_s7 }
   0xc   :  { %p3296_p2 = pnand %p3294_p1, %p3291_p0 }
   0xe   :  { %3299 = shalt.err (!%p3296_p2)
}
   0xf   :  { %s3300_s16 = scalar_lea.vmem %s59_s30, 512  ;;  %p3305_p4 = scmp.lt.s32.totalorder %s59_s30, %s59_s30 }
  0x10   :  { %p3301_p3 = scmp.ne.s32.totalorder %s59_s30, %s3300_s16  ;;  %p3306_p5 = scmp.lt.s32.totalorder %s3300_s16, %s3300_s16 }
  0x12   :  { %p3307_p6 = por %p3306_p5, %p3305_p4 }
  0x14   :  { %p3308_p7 = pnand %p3307_p6, %p3301_p3 }
  0x16   :  { %3311 = shalt.err (!%p3308_p7)
}
  0x17   :  { %s3477_s23 = smov 128   ;;  %s3478_s24 = smov 8  }
  0x18   :  { %64 = dma.hbm_to_vmem [thread:$0]  %s4007_s7, 512, %s59_s30, [#allocation9], %s3477_s23, %s3477_s23, %s3478_s24  }
  0x19   :  { %s3479_s27 = smov [#allocation11]   ;;  %s3480_s29 = smov [#allocation14]  }
  0x1a   :  { %s80_s28 = sshll.u32 %s3479_s27, 4  ;;  %s105_s0 = sshll.u32 %s3480_s29, 4  ;;  %s81_s28 = int_to_ptr.vmem [resolvable:$true] %s80_s28  ;;  %s106_s0 = int_to_ptr.vmem [resolvable:$true] %s105_s0 }
  0x1b   :  { %s3312_s20 = scalar_lea.hbm %s4009_s9, 512 }
  0x1c   :  { %p3313_p8 = scmp.ne.s32.totalorder %s4009_s9, %s3312_s20  ;;  %p3316_p9 = scmp.lt.u32.totalorder %s3312_s20, %s4009_s9 }
  0x1e   :  { %p3318_p10 = pnand %p3316_p9, %p3313_p8 }
  0x20   :  { %3321 = shalt.err (!%p3318_p10)
}
  0x21   :  { %s3322_s7 = scalar_lea.vmem %s81_s28, 512  ;;  %p3327_p12 = scmp.lt.s32.totalorder %s81_s28, %s81_s28 }
  0x22   :  { %p3323_p11 = scmp.ne.s32.totalorder %s81_s28, %s3322_s7  ;;  %p3328_p13 = scmp.lt.s32.totalorder %s3322_s7, %s3322_s7 }
  0x24   :  { %p3329_p0 = por %p3328_p13, %p3327_p12 }
  0x26   :  { %p3330_p1 = pnand %p3329_p0, %p3323_p11 }
  0x28   :  { %3333 = shalt.err (!%p3330_p1)
}
  0x29   :  { %86 = dma.hbm_to_vmem [thread:$0]  %s4009_s9, 512, %s81_s28, [#allocation12], %s3477_s23, %s3477_s23, %s3478_s24  }
  0x2a   :  { %s3334_s29 = scalar_lea.hbm %s4012_s12, 16 }
  0x2b   :  { %p3335_p2 = scmp.ne.s32.totalorder %s4012_s12, %s3334_s29  ;;  %p3338_p3 = scmp.lt.u32.totalorder %s3334_s29, %s4012_s12 }
  0x2d   :  { %p3340_p4 = pnand %p3338_p3, %p3335_p2 }
  0x2f   :  { %3343 = shalt.err (!%p3340_p4)
}
  0x30   :  { %s3344_s22 = scalar_lea.vmem %s106_s0, 16  ;;  %s3348_s2 = scalar_lea.vmem %s106_s0, 32 }
  0x31   :  { %p3345_p5 = scmp.ne.s32.totalorder %s106_s0, %s3344_s22  ;;  %p3349_p6 = scmp.lt.s32.totalorder %s106_s0, %s106_s0 }
  0x32   :  { %p3350_p7 = scmp.lt.s32.totalorder %s3348_s2, %s3344_s22 }
  0x34   :  { %p3351_p8 = por %p3350_p7, %p3349_p6 }
  0x36   :  { %p3352_p9 = pnand %p3351_p8, %p3345_p5 }
  0x38   :  { %3355 = shalt.err (!%p3352_p9)
}
  0x39   :  { %108 = dma.hbm_to_vmem [thread:$0]  %s4012_s12, 16, %s106_s0, [#allocation15]  }
  0x3a   :  { %s3481_s24 = smov [#allocation5]   ;;  %s3482_s16 = smov [#allocation10]  }
  0x3b   :  { %s49_s28 = sshll.u32 %s3481_s24, 4  ;;  %s71_s7 = sshll.u32 %s3482_s16, 4  ;;  %s50_s28 = int_to_ptr.vmem [resolvable:$true] %s49_s28  ;;  %s72_s7 = int_to_ptr.vmem [resolvable:$true] %s71_s7 }
  0x3c   :  { %s3356_s26 = scalar_lea.hbm %s4006_s6, 16 }
  0x3d   :  { %p3357_p10 = scmp.ne.s32.totalorder %s4006_s6, %s3356_s26  ;;  %p3360_p11 = scmp.lt.u32.totalorder %s3356_s26, %s4006_s6 }
  0x3f   :  { %p3362_p12 = pnand %p3360_p11, %p3357_p10 }
  0x41   :  { %3365 = shalt.err (!%p3362_p12)
}
  0x42   :  { %s3366_s12 = scalar_lea.vmem %s50_s28, 16  ;;  %s3370_s0 = scalar_lea.vmem %s50_s28, 32 }
  0x43   :  { %p3367_p13 = scmp.ne.s32.totalorder %s50_s28, %s3366_s12  ;;  %p3371_p0 = scmp.lt.s32.totalorder %s50_s28, %s50_s28 }
  0x44   :  { %p3372_p1 = scmp.lt.s32.totalorder %s3370_s0, %s3366_s12 }
  0x46   :  { %p3373_p2 = por %p3372_p1, %p3371_p0 }
  0x48   :  { %p3374_p3 = pnand %p3373_p2, %p3367_p13 }
  0x4a   :  { %3377 = shalt.err (!%p3374_p3)
}
  0x4b   :  { %52 = dma.hbm_to_vmem [thread:$0]  %s4006_s6, 16, %s50_s28, [#allocation6]  }
  0x4c   :  { %s3378_s9 = scalar_lea.hbm %s4008_s8, 16 }
  0x4d   :  { %p3379_p4 = scmp.ne.s32.totalorder %s4008_s8, %s3378_s9  ;;  %p3382_p5 = scmp.lt.u32.totalorder %s3378_s9, %s4008_s8 }
  0x4f   :  { %p3384_p6 = pnand %p3382_p5, %p3379_p4 }
  0x51   :  { %3387 = shalt.err (!%p3384_p6)
}
  0x52   :  { %s3388_s25 = scalar_lea.vmem %s72_s7, 16  ;;  %s3392_s26 = scalar_lea.vmem %s72_s7, 32 }
  0x53   :  { %p3389_p7 = scmp.ne.s32.totalorder %s72_s7, %s3388_s25  ;;  %p3393_p8 = scmp.lt.s32.totalorder %s72_s7, %s72_s7 }
  0x54   :  { %p3394_p9 = scmp.lt.s32.totalorder %s3392_s26, %s3388_s25 }
  0x56   :  { %p3395_p10 = por %p3394_p9, %p3393_p8 }
  0x58   :  { %p3396_p11 = pnand %p3395_p10, %p3389_p7 }
  0x5a   :  { %3399 = shalt.err (!%p3396_p11)
}
  0x5b   :  { %74 = dma.hbm_to_vmem [thread:$0]  %s4008_s8, 16, %s72_s7, [#allocation9]  }
  0x5c   :  { %s3483_s27 = smov [#allocation13]   ;;  %s3484_s19 = smov [#allocation16]  }
  0x5d   :  { %s93_s29 = sshll.u32 %s3483_s27, 4  ;;  %s117_s1 = sshll.u32 %s3484_s19, 4  ;;  %s94_s29 = int_to_ptr.vmem [resolvable:$true] %s93_s29  ;;  %s118_s1 = int_to_ptr.vmem [resolvable:$true] %s117_s1 }
  0x5e   :  { %s3400_s20 = scalar_lea.hbm %s4010_s10, 16 }
  0x5f   :  { %p3401_p12 = scmp.ne.s32.totalorder %s4010_s10, %s3400_s20  ;;  %p3404_p13 = scmp.lt.u32.totalorder %s3400_s20, %s4010_s10 }
  0x61   :  { %p3406_p0 = pnand %p3404_p13, %p3401_p12 }
  0x63   :  { %3409 = shalt.err (!%p3406_p0)
}
  0x64   :  { %s3410_s8 = scalar_lea.vmem %s94_s29, 16  ;;  %s3414_s7 = scalar_lea.vmem %s94_s29, 32 }
  0x65   :  { %p3411_p1 = scmp.ne.s32.totalorder %s94_s29, %s3410_s8  ;;  %p3415_p2 = scmp.lt.s32.totalorder %s94_s29, %s94_s29 }
  0x66   :  { %p3416_p3 = scmp.lt.s32.totalorder %s3414_s7, %s3410_s8 }
  0x68   :  { %p3417_p4 = por %p3416_p3, %p3415_p2 }
  0x6a   :  { %p3418_p5 = pnand %p3417_p4, %p3411_p1 }
  0x6c   :  { %3421 = shalt.err (!%p3418_p5)
}
  0x6d   :  { %96 = dma.hbm_to_vmem [thread:$0]  %s4010_s10, 16, %s94_s29, [#allocation12]  }
  0x6e   :  { %s3422_s25 = scalar_lea.hbm %s4014_s14, 16 }
  0x6f   :  { %p3423_p6 = scmp.ne.s32.totalorder %s4014_s14, %s3422_s25  ;;  %p3426_p7 = scmp.lt.u32.totalorder %s3422_s25, %s4014_s14 }
  0x71   :  { %p3428_p8 = pnand %p3426_p7, %p3423_p6 }
  0x73   :  { %3431 = shalt.err (!%p3428_p8)
}
  0x74   :  { %s3432_s19 = scalar_lea.vmem %s118_s1, 16  ;;  %s3436_s12 = scalar_lea.vmem %s118_s1, 32 }
  0x75   :  { %p3433_p9 = scmp.ne.s32.totalorder %s118_s1, %s3432_s19  ;;  %p3437_p10 = scmp.lt.s32.totalorder %s118_s1, %s118_s1 }
  0x76   :  { %p3438_p11 = scmp.lt.s32.totalorder %s3436_s12, %s3432_s19 }
  0x78   :  { %p3439_p12 = por %p3438_p11, %p3437_p10 }
  0x7a   :  { %p3440_p13 = pnand %p3439_p12, %p3433_p9 }
  0x7c   :  { %3443 = shalt.err (!%p3440_p13)
}
  0x7d   :  { %120 = dma.hbm_to_vmem [thread:$0]  %s4014_s14, 16, %s118_s1, [#allocation15]  }
  0x7e   :  { %3466 = dma.done.wait [#allocation6], 16  }
  0x7f   :  { %3467 = vsyncadd [#allocation6], 4294967280 }
  0x80   :  { %3468 = dma.done.wait [#allocation9], 528  }
  0x81   :  { %3469 = vsyncadd [#allocation9], 4294966768 }
  0x82   :  { %3470 = dma.done.wait [#allocation12], 528  }
  0x83   :  { %3471 = vsyncadd [#allocation12], 4294966768 }
  0x84   :  { %3472 = dma.done.wait [#allocation15], 32  }
  0x85   :  { %3473 = vsyncadd [#allocation15], 4294967264  ;;  %v3485_v1 = vmov 0.0|0.0   ;;  %vm3486_vm0 = vmmov 0   ;;  %v3487_v2 = vmov 0.0   ;;  %vm161_vm1 = vcmask 130048  }
  0x86   :  { %3026 = vmatprep.subr.bf16.mxu1 %v3485_v1  ;;  %2788 = vmatprep.mubr.msk.f32.mxu1 %vm3486_vm0, %v3487_v2  ;;  %s4025_s14 = sld [smem:[#allocation24_spill]]  ;;  %s4026_s9 = sld [smem:[#allocation23_spill]]  ;;  %v2586_v14 = vld [vmem:[%s4003_s3] ss:$0 sm:$0xff]  ;;  %vm350_vm2 = vcmask 254976   ;;  %vm246_vm3 = vcmask 261120  }
  0x87   :  { %s4027_s23 = sld [smem:[#allocation25_spill]]  ;;  %s3488_s10 = smov 64   ;;  %vm2492_vm4 = vcmask 7168   ;;  %vm2532_vm7 = vcmask 31744   ;;  %vm2562_vm8 = vcmask 122880   ;;  %vm2542_vm9 = vcmask 24576  }
  0x88   :  { %s3489_s3 = smov 32  }
  0x8c   :  { %v146_v3 = vld [vmem:[%s4025_s14] sm:$0xff]  ;;  %v147_v4 = vld [vmem:[%s4025_s14 + $0x8] sm:$0xff] }
  0x8d   :  { %v153_v5 = vld [vmem:[%s4026_s9] sm:$0xff]  ;;  %v3022_v6 = vpack.c.bf16 %v147_v4, %v146_v3  ;;  %v149_v8 = vld [vmem:[%s4027_s23 + $0x8] sm:$0xff]  ;;  %v150_v10 = vld [vmem:[%s4027_s23 + $0x10] sm:$0xff] }
  0x8e   :  { %2777 = vmatprep.mubr.msk.f32.mxu0 %vm161_vm1, %v153_v5  ;;  %v148_v7 = vld [vmem:[%s4027_s23] sm:$0xff]  ;;  %v151_v11 = vld [vmem:[%s4027_s23 + $0x18] sm:$0xff]  ;;  %v154_v12 = vld [vmem:[%s4026_s9 + $0x8] sm:$0xff] }
  0x8f   :  { %v3693_v9 = vpack.c.bf16 %v149_v8, %v148_v7  ;;  %3023 = vmatprep.subr.bf16.mxu0 %v3022_v6  ;;  %v3705_v13 = vpack.c.bf16 %v151_v11, %v150_v10 }
  0x90   :  { %3025 = vmatpush3.bf16.msra.mxu0 %v3022_v6 }
  0x91   :  { %3028 = vmatpush3.bf16.msra.mxu1 %v3693_v9  ;;  %3032 = vmatprep.subr.bf16.mxu0 %v3485_v1 }
  0x92   :  { %3029 = vmatprep.subr.bf16.mxu1 %v3485_v1 }
  0x93   :  { %2778 = vmatmul.mubr.msk.f32.vlgmr.msra.gmra.mrb[0].mxu0 %vm161_vm1, %v154_v12 }
  0x94   :  { %3034 = vmatpush3.bf16.msra.mxu0 %v3693_v9  ;;  %2799 = vmatprep.mubr.msk.f32.mxu0 %vm3486_vm0, %v3487_v2 }
  0x95   :  { %3031 = vmatpush3.bf16.msra.mxu1 %v3705_v13  ;;  %3035 = vmatprep.subr.bf16.mxu0 %v3485_v1 }
  0x96   :  { %3038 = vmatprep.subr.bf16.mxu1 %v3485_v1 }
  0x98   :  { %2789 = vmatmul.mubr.f32.vlgmr.msra.gmra.mrb[0].mxu1 %v3487_v2  ;;  %3037 = vmatpush3.bf16.msra.mxu0 %v3705_v13 }
  0x99   :  { %3040 = vmatpush3.bf16.msra.mxu1 %v3693_v9  ;;  %2810 = vmatprep.mubr.msk.f32.mxu1 %vm3486_vm0, %v3487_v2 }
  0x9a   :  { %3041 = vmatprep.subr.bf16.mxu1 %v3485_v1  ;;  %3044 = vmatprep.subr.bf16.mxu0 %v3485_v1 }
  0x9d   :  { %3043 = vmatpush3.bf16.msra.mxu1 %v3705_v13 }
  0x9e   :  { %3050 = vmatprep.subr.bf16.mxu1 %v3485_v1 }
 0x166   :  { %v2779_v15 = vpop.f32.mrb[0].mxu0 }
 0x167   :  { %v240_v16 = vadd.f32 %v2779_v15, %v2586_v14  ;;  %v234_v17 = vpop.f32.mrb[1].mxu0 }
 0x168   :  { %v235_v18 = vadd.f32 %v2586_v14, %v234_v17 }
 0x169   :  { %244 = vst [vmem:[#allocation3 + $0x8] sm:$0xff] %v240_v16 }
 0x16a   :  { %243 = vst [vmem:[#allocation3] sm:$0xff] %v235_v18 }
 0x16b   :  { %v316_v19 = vpop.f32.mrb[0].mxu1 }
 0x16c   :  { %v2790_v20 = vpop.f32.mrb[1].mxu1 }
 0x171   :  { %v245_v21 = vld [vmem:[#allocation3] sm:$0x3]  ;;  %v353_v38 = vld [vmem:[#allocation3 + $0x2] sm:$0x3]  ;;  %v459_v57 = vld [vmem:[#allocation3 + $0x4] sm:$0x3] }
 0x172   :  { %v320_v22 = vadd.f32 %v316_v19, %v245_v21  ;;  %v565_v16 = vld [vmem:[#allocation3 + $0x6] sm:$0x3] }
 0x174   :  { %v2589_v23 = vmul.f32 -1.442695, %v320_v22 }
 0x176   :  { %3188 = vpow2.f32 %v2589_v23 }
 0x180   :  { %v3189_v24 = vpop.eup %3188 }
 0x181   :  { %v324_v25 = vadd.f32 1.0, %v3189_v24 }
 0x183   :  { %3190 = vrcp.f32 %v324_v25 }
 0x18d   :  { %v3191_v26 = vpop.eup %3190 }
 0x18e   :  { %v327_v27 = vmul.f32 2.0, %v3191_v26  ;;  %v329_v31 = vmul.f32 0.0, %v3191_v26 }
 0x190   :  { %v2590_v28 = vadd.f32 -1.0, %v327_v27 }
 0x192   :  { %331 = vrot.lane.b32.xlu0 %v2590_v28, %s3488_s10 }
 0x204   :  { %v332_v29 = vpop.permute.xlu0 %331 }
 0x205   :  { %v334_v30 = vmul.f32 %v3191_v26, %v332_v29 }
 0x207   :  { %336 = vrot.lane.b32.xlu0 %v334_v30, %s3489_s3 }
 0x279   :  { %v337_v32 = vpop.permute.xlu0 %336 }
 0x27a   :  { %v339_v33 = vadd.f32 %v337_v32, %v329_v31 }
 0x27c   :  { %3192 = vtanh.f32 %v339_v33 }
 0x286   :  { %v3193_v34 = vpop.eup %3192 }
 0x287   :  { %342 = vrot.lane.b32.xlu1 %v3193_v34, %s3488_s10 }
 0x2f9   :  { %v343_v35 = vpop.permute.xlu1 %342 }
 0x2fa   :  { %v345_v36 = vmul.f32 %v3191_v26, %v343_v35  ;;  %v671_v35 = vld [vmem:[#allocation3 + $0x8] sm:$0x3] }
 0x2fc   :  { %347 = vrot.lane.b32.xlu1 %v345_v36, %s3489_s3 }
 0x36e   :  { %v348_v37 = vpop.permute.xlu1 %347 }
 0x36f   :  { %351 = vst.msk [vmem:[#allocation2] sm:$0x3] %vm350_vm2, %v348_v37  ;;  %2800 = vmatmul.mubr.msk.f32.vlgmr.msra.gmra.mrb[2].mxu0 %vm246_vm3, %v348_v37 }
 0x370   :  { %3046 = vmatpush3.bf16.msra.mxu0 %v3693_v9  ;;  %2821 = vmatprep.mubr.msk.f32.mxu0 %vm3486_vm0, %v3487_v2 }
 0x371   :  { %3047 = vmatprep.subr.bf16.mxu0 %v3485_v1 }
 0x374   :  { %3049 = vmatpush3.bf16.msra.mxu0 %v3705_v13 }
 0x375   :  { %3056 = vmatprep.subr.bf16.mxu0 %v3485_v1 }
 0x442   :  { %v422_v39 = vpop.f32.mrb[2].mxu0 }
 0x443   :  { %v426_v40 = vadd.f32 %v422_v39, %v353_v38  ;;  %v2801_v41 = vpop.f32.mrb[3].mxu0 }
 0x445   :  { %v2592_v42 = vmul.f32 -1.442695, %v426_v40 }
 0x447   :  { %3194 = vpow2.f32 %v2592_v42 }
 0x451   :  { %v3195_v43 = vpop.eup %3194 }
 0x452   :  { %v430_v44 = vadd.f32 1.0, %v3195_v43 }
 0x454   :  { %3196 = vrcp.f32 %v430_v44 }
 0x45e   :  { %v3197_v45 = vpop.eup %3196 }
 0x45f   :  { %v433_v46 = vmul.f32 2.0, %v3197_v45  ;;  %v435_v50 = vmul.f32 %v3197_v45, %v339_v33 }
 0x461   :  { %v2593_v47 = vadd.f32 -1.0, %v433_v46 }
 0x463   :  { %437 = vrot.lane.b32.xlu0 %v2593_v47, %s3488_s10 }
 0x4d5   :  { %v438_v48 = vpop.permute.xlu0 %437 }
 0x4d6   :  { %v440_v49 = vmul.f32 %v3197_v45, %v438_v48 }
 0x4d8   :  { %442 = vrot.lane.b32.xlu1 %v440_v49, %s3489_s3 }
 0x54a   :  { %v443_v51 = vpop.permute.xlu1 %442 }
 0x54b   :  { %v445_v52 = vadd.f32 %v443_v51, %v435_v50 }
 0x54d   :  { %3198 = vtanh.f32 %v445_v52 }
 0x557   :  { %v3199_v53 = vpop.eup %3198 }
 0x558   :  { %448 = vrot.lane.b32.xlu0 %v3199_v53, %s3488_s10 }
 0x5ca   :  { %v449_v54 = vpop.permute.xlu0 %448 }
 0x5cb   :  { %v451_v55 = vmul.f32 %v3197_v45, %v449_v54  ;;  %v777_v54 = vld [vmem:[#allocation3 + $0xa] sm:$0x3] }
 0x5cd   :  { %453 = vrot.lane.b32.xlu1 %v451_v55, %s3489_s3 }
 0x63f   :  { %v454_v56 = vpop.permute.xlu1 %453 }
 0x640   :  { %457 = vst.msk [vmem:[#allocation2 + $0x2] sm:$0x3] %vm350_vm2, %v454_v56  ;;  %2811 = vmatmul.mubr.msk.f32.vlgmr.msra.gmra.mrb[2].mxu1 %vm246_vm3, %v454_v56 }
 0x641   :  { %3052 = vmatpush3.bf16.msra.mxu1 %v3693_v9  ;;  %2832 = vmatprep.mubr.msk.f32.mxu1 %vm3486_vm0, %v3487_v2 }
 0x642   :  { %3053 = vmatprep.subr.bf16.mxu1 %v3485_v1 }
 0x645   :  { %3055 = vmatpush3.bf16.msra.mxu1 %v3705_v13 }
 0x646   :  { %3062 = vmatprep.subr.bf16.mxu1 %v3485_v1 }
 0x713   :  { %v528_v58 = vpop.f32.mrb[2].mxu1 }
 0x714   :  { %v532_v59 = vadd.f32 %v528_v58, %v459_v57  ;;  %v2812_v60 = vpop.f32.mrb[3].mxu1 }
 0x716   :  { %v2595_v61 = vmul.f32 -1.442695, %v532_v59 }
 0x718   :  { %3200 = vpow2.f32 %v2595_v61 }
 0x722   :  { %v3201_v62 = vpop.eup %3200 }
 0x723   :  { %v536_v63 = vadd.f32 1.0, %v3201_v62 }
 0x725   :  { %3202 = vrcp.f32 %v536_v63 }
 0x72f   :  { %v3203_v0 = vpop.eup %3202 }
 0x730   :  { %v539_v3 = vmul.f32 2.0, %v3203_v0  ;;  %v541_v7 = vmul.f32 %v3203_v0, %v445_v52 }
 0x732   :  { %v2596_v4 = vadd.f32 -1.0, %v539_v3 }
 0x734   :  { %543 = vrot.lane.b32.xlu0 %v2596_v4, %s3488_s10 }
 0x7a6   :  { %v544_v5 = vpop.permute.xlu0 %543 }
 0x7a7   :  { %v546_v6 = vmul.f32 %v3203_v0, %v544_v5 }
 0x7a9   :  { %548 = vrot.lane.b32.xlu1 %v546_v6, %s3489_s3 }
 0x81b   :  { %v549_v8 = vpop.permute.xlu1 %548 }
 0x81c   :  { %v551_v10 = vadd.f32 %v549_v8, %v541_v7 }
 0x81e   :  { %3204 = vtanh.f32 %v551_v10 }
 0x828   :  { %v3205_v11 = vpop.eup %3204 }
 0x829   :  { %554 = vrot.lane.b32.xlu0 %v3205_v11, %s3488_s10  ;;  %v883_v11 = vld [vmem:[#allocation3 + $0xc] sm:$0x3] }
 0x89b   :  { %v555_v12 = vpop.permute.xlu0 %554 }
 0x89c   :  { %v557_v14 = vmul.f32 %v3203_v0, %v555_v12 }
 0x89e   :  { %559 = vrot.lane.b32.xlu1 %v557_v14, %s3489_s3 }
 0x910   :  { %v560_v15 = vpop.permute.xlu1 %559 }
 0x911   :  { %563 = vst.msk [vmem:[#allocation2 + $0x4] sm:$0x3] %vm350_vm2, %v560_v15  ;;  %2822 = vmatmul.mubr.msk.f32.vlgmr.msra.gmra.mrb[4].mxu0 %vm246_vm3, %v560_v15 }
 0x912   :  { %3058 = vmatpush3.bf16.msra.mxu0 %v3693_v9  ;;  %2843 = vmatprep.mubr.msk.f32.mxu0 %vm3486_vm0, %v3487_v2 }
 0x913   :  { %3059 = vmatprep.subr.bf16.mxu0 %v3485_v1 }
 0x916   :  { %3061 = vmatpush3.bf16.msra.mxu0 %v3705_v13 }
 0x917   :  { %3068 = vmatprep.subr.bf16.mxu0 %v3485_v1 }
 0x9e4   :  { %v634_v17 = vpop.f32.mrb[4].mxu0 }
 0x9e5   :  { %v638_v18 = vadd.f32 %v634_v17, %v565_v16  ;;  %v2823_v19 = vpop.f32.mrb[5].mxu0 }
 0x9e7   :  { %v2598_v20 = vmul.f32 -1.442695, %v638_v18 }
 0x9e9   :  { %3206 = vpow2.f32 %v2598_v20 }
 0x9f3   :  { %v3207_v21 = vpop.eup %3206 }
 0x9f4   :  { %v642_v22 = vadd.f32 1.0, %v3207_v21 }
 0x9f6   :  { %3208 = vrcp.f32 %v642_v22 }
 0xa00   :  { %v3209_v23 = vpop.eup %3208 }
 0xa01   :  { %v645_v24 = vmul.f32 2.0, %v3209_v23  ;;  %v647_v28 = vmul.f32 %v3209_v23, %v551_v10 }
 0xa03   :  { %v2599_v25 = vadd.f32 -1.0, %v645_v24 }
 0xa05   :  { %649 = vrot.lane.b32.xlu0 %v2599_v25, %s3488_s10 }
 0xa77   :  { %v650_v26 = vpop.permute.xlu0 %649 }
 0xa78   :  { %v652_v27 = vmul.f32 %v3209_v23, %v650_v26 }
 0xa7a   :  { %654 = vrot.lane.b32.xlu1 %v652_v27, %s3489_s3 }
 0xaec   :  { %v655_v29 = vpop.permute.xlu1 %654 }
 0xaed   :  { %v657_v30 = vadd.f32 %v655_v29, %v647_v28 }
 0xaef   :  { %3210 = vtanh.f32 %v657_v30 }
 0xaf9   :  { %v3211_v31 = vpop.eup %3210 }
 0xafa   :  { %660 = vrot.lane.b32.xlu0 %v3211_v31, %s3488_s10  ;;  %v989_v31 = vld [vmem:[#allocation3 + $0xe] sm:$0x3] }
 0xb6c   :  { %v661_v32 = vpop.permute.xlu0 %660 }
 0xb6d   :  { %v663_v33 = vmul.f32 %v3209_v23, %v661_v32 }
 0xb6f   :  { %665 = vrot.lane.b32.xlu1 %v663_v33, %s3489_s3 }
 0xbe1   :  { %v666_v34 = vpop.permute.xlu1 %665 }
 0xbe2   :  { %669 = vst.msk [vmem:[#allocation2 + $0x6] sm:$0x3] %vm350_vm2, %v666_v34  ;;  %2833 = vmatmul.mubr.msk.f32.vlgmr.msra.gmra.mrb[4].mxu1 %vm246_vm3, %v666_v34 }
 0xbe3   :  { %3064 = vmatpush3.bf16.msra.mxu1 %v3693_v9  ;;  %2854 = vmatprep.mubr.msk.f32.mxu1 %vm3486_vm0, %v3487_v2 }
 0xbe4   :  { %3065 = vmatprep.subr.bf16.mxu1 %v3485_v1 }
 0xbe7   :  { %3067 = vmatpush3.bf16.msra.mxu1 %v3705_v13 }
 0xbe9   :  { %v1103_v10 = vld [vmem:[#allocation2] sm:$0xff] }
 0xcb5   :  { %v740_v36 = vpop.f32.mrb[4].mxu1 }
 0xcb6   :  { %v744_v37 = vadd.f32 %v740_v36, %v671_v35  ;;  %v2834_v38 = vpop.f32.mrb[5].mxu1 }
 0xcb8   :  { %v2601_v39 = vmul.f32 -1.442695, %v744_v37 }
 0xcba   :  { %3212 = vpow2.f32 %v2601_v39 }
 0xcc4   :  { %v3213_v40 = vpop.eup %3212 }
 0xcc5   :  { %v748_v41 = vadd.f32 1.0, %v3213_v40 }
 0xcc7   :  { %3214 = vrcp.f32 %v748_v41 }
 0xcd1   :  { %v3215_v42 = vpop.eup %3214 }
 0xcd2   :  { %v751_v43 = vmul.f32 2.0, %v3215_v42  ;;  %v753_v47 = vmul.f32 %v3215_v42, %v657_v30 }
 0xcd4   :  { %v2602_v44 = vadd.f32 -1.0, %v751_v43 }
 0xcd6   :  { %755 = vrot.lane.b32.xlu0 %v2602_v44, %s3488_s10 }
 0xd48   :  { %v756_v45 = vpop.permute.xlu0 %755 }
 0xd49   :  { %v758_v46 = vmul.f32 %v3215_v42, %v756_v45 }
 0xd4b   :  { %760 = vrot.lane.b32.xlu1 %v758_v46, %s3489_s3 }
 0xdbd   :  { %v761_v48 = vpop.permute.xlu1 %760 }
 0xdbe   :  { %v763_v49 = vadd.f32 %v761_v48, %v753_v47  ;;  %v1094_v47 = vld [vmem:[%s4004_s4] sm:$0xff]  ;;  %v1095_v48 = vld [vmem:[%s4004_s4 + $0x8] sm:$0xff] }
 0xdc0   :  { %3216 = vtanh.f32 %v763_v49 }
 0xdca   :  { %v3217_v50 = vpop.eup %3216 }
 0xdcb   :  { %766 = vrot.lane.b32.xlu0 %v3217_v50, %s3488_s10  ;;  %v1096_v50 = vld [vmem:[%s4004_s4 + $0x10] sm:$0xff] }
 0xe3d   :  { %v767_v51 = vpop.permute.xlu0 %766 }
 0xe3e   :  { %v769_v52 = vmul.f32 %v3215_v42, %v767_v51  ;;  %v1097_v51 = vld [vmem:[%s4004_s4 + $0x18] sm:$0xff] }
 0xe40   :  { %771 = vrot.lane.b32.xlu1 %v769_v52, %s3489_s3  ;;  %v3078_v52 = vpack.c.bf16 %v1097_v51, %v1096_v50 }
 0xeb2   :  { %v772_v53 = vpop.permute.xlu1 %771 }
 0xeb3   :  { %775 = vst.msk [vmem:[#allocation2 + $0x8] sm:$0x3] %vm350_vm2, %v772_v53  ;;  %2844 = vmatmul.mubr.msk.f32.vlgmr.msra.gmra.mrb[6].mxu0 %vm246_vm3, %v772_v53  ;;  %v1098_v53 = vld [vmem:[%s4005_s5] sm:$0xff] }
 0xeb4   :  { %3070 = vmatpush3.bf16.msra.mxu0 %v3693_v9  ;;  %2865 = vmatprep.mubr.msk.f32.mxu0 %vm3486_vm0, %v3487_v2 }
 0xeb5   :  { %3071 = vmatprep.subr.bf16.mxu0 %v3485_v1 }
 0xeb8   :  { %3073 = vmatpush3.bf16.msra.mxu0 %v3705_v13 }
 0xeb9   :  { %3082 = vmatprep.subr.bf16.mxu0 %v3485_v1 }
 0xf86   :  { %v846_v55 = vpop.f32.mrb[6].mxu0 }
 0xf87   :  { %v850_v56 = vadd.f32 %v846_v55, %v777_v54  ;;  %v2845_v57 = vpop.f32.mrb[7].mxu0  ;;  %v1099_v54 = vld [vmem:[%s4005_s5 + $0x8] sm:$0xff]  ;;  %v1100_v55 = vld [vmem:[%s4005_s5 + $0x10] sm:$0xff] }
 0xf88   :  { %v1101_v57 = vld [vmem:[%s4005_s5 + $0x18] sm:$0xff] }
 0xf89   :  { %v2604_v58 = vmul.f32 -1.442695, %v850_v56  ;;  %v3827_v56 = vpack.c.bf16 %v1099_v54, %v1098_v53 }
 0xf8b   :  { %3218 = vpow2.f32 %v2604_v58 }
 0xf95   :  { %v3219_v59 = vpop.eup %3218 }
 0xf96   :  { %v854_v60 = vadd.f32 1.0, %v3219_v59 }
 0xf98   :  { %3220 = vrcp.f32 %v854_v60  ;;  %v3833_v60 = vpack.c.bf16 %v1101_v57, %v1100_v55 }
 0xfa2   :  { %v3221_v61 = vpop.eup %3220 }
 0xfa3   :  { %v857_v9 = vmul.f32 2.0, %v3221_v61  ;;  %v859_v13 = vmul.f32 %v3221_v61, %v763_v49  ;;  %v3074_v49 = vpack.c.bf16 %v1095_v48, %v1094_v47 }
 0xfa5   :  { %v2605_v62 = vadd.f32 -1.0, %v857_v9  ;;  %3075 = vmatprep.subr.bf16.mxu1 %v3074_v49 }
 0xfa7   :  { %861 = vrot.lane.b32.xlu0 %v2605_v62, %s3488_s10 }
0x1019   :  { %v862_v63 = vpop.permute.xlu0 %861 }
0x101a   :  { %v864_v0 = vmul.f32 %v3221_v61, %v862_v63 }
0x101c   :  { %866 = vrot.lane.b32.xlu1 %v864_v0, %s3489_s3  ;;  %v2612_v0 = vld [vmem:[#allocation5] ss:$0 sm:$0xff] }
0x108e   :  { %v867_v3 = vpop.permute.xlu1 %866 }
0x108f   :  { %v869_v4 = vadd.f32 %v867_v3, %v859_v13 }
0x1091   :  { %3222 = vtanh.f32 %v869_v4 }
0x109b   :  { %v3223_v5 = vpop.eup %3222 }
0x109c   :  { %872 = vrot.lane.b32.xlu0 %v3223_v5, %s3488_s10 }
0x110e   :  { %v873_v6 = vpop.permute.xlu0 %872 }
0x110f   :  { %v875_v7 = vmul.f32 %v3221_v61, %v873_v6 }
0x1111   :  { %877 = vrot.lane.b32.xlu1 %v875_v7, %s3489_s3 }
0x1183   :  { %v878_v8 = vpop.permute.xlu1 %877 }
0x1184   :  { %881 = vst.msk [vmem:[#allocation2 + $0xa] sm:$0x3] %vm350_vm2, %v878_v8  ;;  %2855 = vmatmul.mubr.msk.f32.vlgmr.msra.gmra.mrb[6].mxu1 %vm246_vm3, %v878_v8 }
0x1185   :  { %2876 = vmatprep.mubr.msk.f32.mxu1 %vm246_vm3, %v1103_v10  ;;  %3077 = vmatpush3.bf16.msra.mxu1 %v3074_v49 }
0x1186   :  { %3079 = vmatprep.subr.bf16.mxu1 %v3078_v52 }
0x1189   :  { %3081 = vmatpush3.bf16.msra.mxu1 %v3078_v52 }
0x118a   :  { %3088 = vmatprep.subr.bf16.mxu1 %v3485_v1 }
0x1257   :  { %v952_v12 = vpop.f32.mrb[6].mxu1 }
0x1258   :  { %v956_v14 = vadd.f32 %v952_v12, %v883_v11  ;;  %v2856_v15 = vpop.f32.mrb[7].mxu1 }
0x125a   :  { %v2607_v16 = vmul.f32 -1.442695, %v956_v14 }
0x125c   :  { %3224 = vpow2.f32 %v2607_v16 }
0x1266   :  { %v3225_v17 = vpop.eup %3224 }
0x1267   :  { %v960_v18 = vadd.f32 1.0, %v3225_v17 }
0x1269   :  { %3226 = vrcp.f32 %v960_v18 }
0x1273   :  { %v3227_v19 = vpop.eup %3226 }
0x1274   :  { %v963_v20 = vmul.f32 2.0, %v3227_v19  ;;  %v965_v24 = vmul.f32 %v3227_v19, %v869_v4 }
0x1276   :  { %v2608_v21 = vadd.f32 -1.0, %v963_v20 }
0x1278   :  { %967 = vrot.lane.b32.xlu0 %v2608_v21, %s3488_s10 }
0x12ea   :  { %v968_v22 = vpop.permute.xlu0 %967 }
0x12eb   :  { %v970_v23 = vmul.f32 %v3227_v19, %v968_v22 }
0x12ed   :  { %972 = vrot.lane.b32.xlu1 %v970_v23, %s3489_s3 }
0x135f   :  { %v973_v25 = vpop.permute.xlu1 %972 }
0x1360   :  { %v975_v26 = vadd.f32 %v973_v25, %v965_v24 }
0x1362   :  { %3228 = vtanh.f32 %v975_v26 }
0x136c   :  { %v3229_v27 = vpop.eup %3228 }
0x136d   :  { %978 = vrot.lane.b32.xlu0 %v3229_v27, %s3488_s10 }
0x13df   :  { %v979_v28 = vpop.permute.xlu0 %978 }
0x13e0   :  { %v981_v29 = vmul.f32 %v3227_v19, %v979_v28 }
0x13e2   :  { %983 = vrot.lane.b32.xlu1 %v981_v29, %s3489_s3 }
0x1454   :  { %v984_v30 = vpop.permute.xlu1 %983 }
0x1455   :  { %987 = vst.msk [vmem:[#allocation2 + $0xc] sm:$0x3] %vm350_vm2, %v984_v30  ;;  %2866 = vmatmul.mubr.msk.f32.vlgmr.msra.gmra.mrb[8].mxu0 %vm246_vm3, %v984_v30 }
0x1456   :  { %2887 = vmatprep.mubr.msk.f32.mxu0 %vm3486_vm0, %v3487_v2  ;;  %3084 = vmatpush3.bf16.msra.mxu0 %v3827_v56 }
0x1457   :  { %3085 = vmatprep.subr.bf16.mxu0 %v3485_v1 }
0x145a   :  { %3087 = vmatpush3.bf16.msra.mxu0 %v3833_v60 }
0x145b   :  { %3094 = vmatprep.subr.bf16.mxu0 %v3485_v1 }
0x145d   :  { %2888 = vmatmul.mubr.f32.vlgmr.msra.gmra.mrb[10].mxu0 %v3487_v2 }
0x145e   :  { %3096 = vmatpush3.bf16.msra.mxu0 %v3827_v56  ;;  %2909 = vmatprep.mubr.msk.f32.mxu0 %vm3486_vm0, %v3487_v2 }
0x145f   :  { %3097 = vmatprep.subr.bf16.mxu0 %v3485_v1 }
0x1462   :  { %3099 = vmatpush3.bf16.msra.mxu0 %v3833_v60 }
0x1463   :  { %3106 = vmatprep.subr.bf16.mxu0 %v3485_v1 }
0x1528   :  { %v1058_v32 = vpop.f32.mrb[8].mxu0 }
0x1529   :  { %v1062_v33 = vadd.f32 %v1058_v32, %v989_v31  ;;  %v2867_v34 = vpop.f32.mrb[9].mxu0 }
0x152b   :  { %v2610_v35 = vmul.f32 -1.442695, %v1062_v33 }
0x152d   :  { %3230 = vpow2.f32 %v2610_v35 }
0x1530   :  { %v1261_v62 = vpop.f32.mrb[10].mxu0 }
0x1531   :  { %v2889_v63 = vpop.f32.mrb[11].mxu0 }
0x1537   :  { %v3231_v36 = vpop.eup %3230 }
0x1538   :  { %v1066_v37 = vadd.f32 1.0, %v3231_v36 }
0x153a   :  { %3232 = vrcp.f32 %v1066_v37 }
0x1544   :  { %v3233_v38 = vpop.eup %3232 }
0x1545   :  { %v1069_v39 = vmul.f32 2.0, %v3233_v38  ;;  %v1071_v43 = vmul.f32 %v3233_v38, %v975_v26 }
0x1547   :  { %v2611_v40 = vadd.f32 -1.0, %v1069_v39 }
0x1549   :  { %1073 = vrot.lane.b32.xlu0 %v2611_v40, %s3488_s10 }
0x15bb   :  { %v1074_v41 = vpop.permute.xlu0 %1073 }
0x15bc   :  { %v1076_v42 = vmul.f32 %v3233_v38, %v1074_v41 }
0x15be   :  { %1078 = vrot.lane.b32.xlu1 %v1076_v42, %s3489_s3 }
0x1630   :  { %v1079_v44 = vpop.permute.xlu1 %1078 }
0x1631   :  { %v1081_v45 = vadd.f32 %v1079_v44, %v1071_v43 }
0x1633   :  { %3234 = vtanh.f32 %v1081_v45 }
0x163d   :  { %v3235_v46 = vpop.eup %3234 }
0x163e   :  { %1084 = vrot.lane.b32.xlu0 %v3235_v46, %s3488_s10 }
0x16b0   :  { %v1085_v58 = vpop.permute.xlu0 %1084 }
0x16b1   :  { %v1087_v59 = vmul.f32 %v3233_v38, %v1085_v58 }
0x16b3   :  { %1089 = vrot.lane.b32.xlu1 %v1087_v59, %s3489_s3 }
0x1725   :  { %v1090_v61 = vpop.permute.xlu1 %1089 }
0x1726   :  { %1093 = vst.msk [vmem:[#allocation2 + $0xe] sm:$0x3] %vm350_vm2, %v1090_v61 }
0x172d   :  { %v1104_v9 = vld [vmem:[#allocation2 + $0x8] sm:$0xff] }
0x172e   :  { %2877 = vmatmul.mubr.msk.f32.vlgmr.msra.gmra.mrb[8].mxu1 %vm246_vm3, %v1104_v9 }
0x172f   :  { %3090 = vmatpush3.bf16.msra.mxu1 %v3827_v56  ;;  %2898 = vmatprep.mubr.msk.f32.mxu1 %vm3486_vm0, %v3487_v2 }
0x1730   :  { %3091 = vmatprep.subr.bf16.mxu1 %v3485_v1 }
0x1733   :  { %3093 = vmatpush3.bf16.msra.mxu1 %v3833_v60 }
0x1734   :  { %3100 = vmatprep.subr.bf16.mxu1 %v3485_v1 }
0x1801   :  { %v2878_v13 = vpop.f32.mrb[8].mxu1 }
0x1802   :  { %v1189_v3 = vadd.f32 %v2878_v13, %v2612_v0  ;;  %v1183_v4 = vpop.f32.mrb[9].mxu1 }
0x1803   :  { %v1184_v5 = vadd.f32 %v2612_v0, %v1183_v4 }
0x1804   :  { %1193 = vst [vmem:[#allocation3 + $0x8] sm:$0xff] %v1189_v3 }
0x1805   :  { %1192 = vst [vmem:[#allocation3] sm:$0xff] %v1184_v5 }
0x180c   :  { %v1194_v6 = vld [vmem:[#allocation3] sm:$0x3]  ;;  %v1296_v25 = vld [vmem:[#allocation3 + $0x2] sm:$0x3]  ;;  %v1400_v44 = vld [vmem:[#allocation3 + $0x4] sm:$0x3] }
0x180d   :  { %v1265_v7 = vadd.f32 %v1261_v62, %v1194_v6  ;;  %v1504_v0 = vld [vmem:[#allocation3 + $0x6] sm:$0x3] }
0x180f   :  { %v2615_v8 = vmul.f32 -1.442695, %v1265_v7 }
0x1811   :  { %3236 = vpow2.f32 %v2615_v8 }
0x181b   :  { %v3237_v10 = vpop.eup %3236 }
0x181c   :  { %v1269_v11 = vadd.f32 1.0, %v3237_v10 }
0x181e   :  { %3238 = vrcp.f32 %v1269_v11 }
0x1828   :  { %v3239_v12 = vpop.eup %3238 }
0x1829   :  { %v1272_v14 = vmul.f32 2.0, %v3239_v12  ;;  %v1274_v18 = vmul.f32 0.0, %v3239_v12 }
0x182b   :  { %v2616_v15 = vadd.f32 -1.0, %v1272_v14 }
0x182d   :  { %1276 = vrot.lane.b32.xlu0 %v2616_v15, %s3488_s10 }
0x189f   :  { %v1277_v16 = vpop.permute.xlu0 %1276 }
0x18a0   :  { %v1279_v17 = vmul.f32 %v3239_v12, %v1277_v16 }
0x18a2   :  { %1281 = vrot.lane.b32.xlu1 %v1279_v17, %s3489_s3 }
0x1914   :  { %v1282_v19 = vpop.permute.xlu1 %1281 }
0x1915   :  { %v1284_v20 = vadd.f32 %v1282_v19, %v1274_v18 }
0x1917   :  { %3240 = vtanh.f32 %v1284_v20 }
0x1921   :  { %v3241_v21 = vpop.eup %3240 }
0x1922   :  { %1287 = vrot.lane.b32.xlu0 %v3241_v21, %s3488_s10 }
0x1994   :  { %v1288_v22 = vpop.permute.xlu0 %1287 }
0x1995   :  { %v1290_v23 = vmul.f32 %v3239_v12, %v1288_v22  ;;  %v1608_v22 = vld [vmem:[#allocation3 + $0x8] sm:$0x3] }
0x1997   :  { %1292 = vrot.lane.b32.xlu1 %v1290_v23, %s3489_s3 }
0x1a09   :  { %v1293_v24 = vpop.permute.xlu1 %1292 }
0x1a0a   :  { %1295 = vst.msk [vmem:[#allocation2] sm:$0x3] %vm350_vm2, %v1293_v24  ;;  %2899 = vmatmul.mubr.msk.f32.vlgmr.msra.gmra.mrb[10].mxu1 %vm246_vm3, %v1293_v24 }
0x1a0b   :  { %3102 = vmatpush3.bf16.msra.mxu1 %v3827_v56  ;;  %2920 = vmatprep.mubr.msk.f32.mxu1 %vm3486_vm0, %v3487_v2 }
0x1a0c   :  { %3103 = vmatprep.subr.bf16.mxu1 %v3485_v1 }
0x1a0f   :  { %3105 = vmatpush3.bf16.msra.mxu1 %v3833_v60 }
0x1a10   :  { %3112 = vmatprep.subr.bf16.mxu1 %v3485_v1 }
0x1add   :  { %v1365_v26 = vpop.f32.mrb[10].mxu1 }
0x1ade   :  { %v1369_v27 = vadd.f32 %v1365_v26, %v1296_v25  ;;  %v2900_v28 = vpop.f32.mrb[11].mxu1 }
0x1ae0   :  { %v2618_v29 = vmul.f32 -1.442695, %v1369_v27 }
0x1ae2   :  { %3242 = vpow2.f32 %v2618_v29 }
0x1aec   :  { %v3243_v30 = vpop.eup %3242 }
0x1aed   :  { %v1373_v31 = vadd.f32 1.0, %v3243_v30 }
0x1aef   :  { %3244 = vrcp.f32 %v1373_v31 }
0x1af9   :  { %v3245_v32 = vpop.eup %3244 }
0x1afa   :  { %v1376_v33 = vmul.f32 2.0, %v3245_v32  ;;  %v1378_v37 = vmul.f32 %v3245_v32, %v1284_v20 }
0x1afc   :  { %v2619_v34 = vadd.f32 -1.0, %v1376_v33 }
0x1afe   :  { %1380 = vrot.lane.b32.xlu0 %v2619_v34, %s3488_s10 }
0x1b70   :  { %v1381_v35 = vpop.permute.xlu0 %1380 }
0x1b71   :  { %v1383_v36 = vmul.f32 %v3245_v32, %v1381_v35 }
0x1b73   :  { %1385 = vrot.lane.b32.xlu1 %v1383_v36, %s3489_s3 }
0x1be5   :  { %v1386_v38 = vpop.permute.xlu1 %1385 }
0x1be6   :  { %v1388_v39 = vadd.f32 %v1386_v38, %v1378_v37 }
0x1be8   :  { %3246 = vtanh.f32 %v1388_v39 }
0x1bf2   :  { %v3247_v40 = vpop.eup %3246 }
0x1bf3   :  { %1391 = vrot.lane.b32.xlu0 %v3247_v40, %s3488_s10 }
0x1c65   :  { %v1392_v41 = vpop.permute.xlu0 %1391 }
0x1c66   :  { %v1394_v42 = vmul.f32 %v3245_v32, %v1392_v41  ;;  %v1712_v41 = vld [vmem:[#allocation3 + $0xa] sm:$0x3] }
0x1c68   :  { %1396 = vrot.lane.b32.xlu1 %v1394_v42, %s3489_s3 }
0x1cda   :  { %v1397_v43 = vpop.permute.xlu1 %1396 }
0x1cdb   :  { %1399 = vst.msk [vmem:[#allocation2 + $0x2] sm:$0x3] %vm350_vm2, %v1397_v43  ;;  %2910 = vmatmul.mubr.msk.f32.vlgmr.msra.gmra.mrb[12].mxu0 %vm246_vm3, %v1397_v43 }
0x1cdc   :  { %3108 = vmatpush3.bf16.msra.mxu0 %v3827_v56  ;;  %2931 = vmatprep.mubr.msk.f32.mxu0 %vm3486_vm0, %v3487_v2 }
0x1cdd   :  { %3109 = vmatprep.subr.bf16.mxu0 %v3485_v1 }
0x1ce0   :  { %3111 = vmatpush3.bf16.msra.mxu0 %v3833_v60 }
0x1ce1   :  { %3118 = vmatprep.subr.bf16.mxu0 %v3485_v1 }
0x1dae   :  { %v1469_v45 = vpop.f32.mrb[12].mxu0 }
0x1daf   :  { %v1473_v46 = vadd.f32 %v1469_v45, %v1400_v44  ;;  %v2911_v47 = vpop.f32.mrb[13].mxu0 }
0x1db1   :  { %v2621_v48 = vmul.f32 -1.442695, %v1473_v46 }
0x1db3   :  { %3248 = vpow2.f32 %v2621_v48 }
0x1dbd   :  { %v3249_v49 = vpop.eup %3248 }
0x1dbe   :  { %v1477_v50 = vadd.f32 1.0, %v3249_v49 }
0x1dc0   :  { %3250 = vrcp.f32 %v1477_v50 }
0x1dca   :  { %v3251_v51 = vpop.eup %3250 }
0x1dcb   :  { %v1480_v52 = vmul.f32 2.0, %v3251_v51  ;;  %v1482_v57 = vmul.f32 %v3251_v51, %v1388_v39 }
0x1dcd   :  { %v2622_v53 = vadd.f32 -1.0, %v1480_v52 }
0x1dcf   :  { %1484 = vrot.lane.b32.xlu0 %v2622_v53, %s3488_s10 }
0x1e41   :  { %v1485_v54 = vpop.permute.xlu0 %1484 }
0x1e42   :  { %v1487_v55 = vmul.f32 %v3251_v51, %v1485_v54 }
0x1e44   :  { %1489 = vrot.lane.b32.xlu1 %v1487_v55, %s3489_s3 }
0x1eb6   :  { %v1490_v58 = vpop.permute.xlu1 %1489 }
0x1eb7   :  { %v1492_v59 = vadd.f32 %v1490_v58, %v1482_v57 }
0x1eb9   :  { %3252 = vtanh.f32 %v1492_v59 }
0x1ec3   :  { %v3253_v61 = vpop.eup %3252 }
0x1ec4   :  { %1495 = vrot.lane.b32.xlu0 %v3253_v61, %s3488_s10 }
0x1f36   :  { %v1496_v9 = vpop.permute.xlu0 %1495 }
0x1f37   :  { %v1498_v62 = vmul.f32 %v3251_v51, %v1496_v9 }
0x1f39   :  { %1500 = vrot.lane.b32.xlu1 %v1498_v62, %s3489_s3 }
0x1fab   :  { %v1501_v63 = vpop.permute.xlu1 %1500 }
0x1fac   :  { %1503 = vst.msk [vmem:[#allocation2 + $0x4] sm:$0x3] %vm350_vm2, %v1501_v63  ;;  %2921 = vmatmul.mubr.msk.f32.vlgmr.msra.gmra.mrb[12].mxu1 %vm246_vm3, %v1501_v63 }
0x1fad   :  { %3114 = vmatpush3.bf16.msra.mxu1 %v3827_v56  ;;  %2942 = vmatprep.mubr.msk.f32.mxu1 %vm3486_vm0, %v3487_v2 }
0x1fae   :  { %3115 = vmatprep.subr.bf16.mxu1 %v3485_v1 }
0x1fb1   :  { %3117 = vmatpush3.bf16.msra.mxu1 %v3833_v60 }
0x1fb2   :  { %3124 = vmatprep.subr.bf16.mxu1 %v3485_v1 }
0x207f   :  { %v1573_v13 = vpop.f32.mrb[12].mxu1 }
0x2080   :  { %v1577_v3 = vadd.f32 %v1573_v13, %v1504_v0  ;;  %v2922_v4 = vpop.f32.mrb[13].mxu1 }
0x2082   :  { %v2624_v5 = vmul.f32 -1.442695, %v1577_v3 }
0x2084   :  { %3254 = vpow2.f32 %v2624_v5 }
0x208e   :  { %v3255_v6 = vpop.eup %3254 }
0x208f   :  { %v1581_v7 = vadd.f32 1.0, %v3255_v6 }
0x2091   :  { %3256 = vrcp.f32 %v1581_v7 }
0x209b   :  { %v3257_v8 = vpop.eup %3256 }
0x209c   :  { %v1584_v10 = vmul.f32 2.0, %v3257_v8  ;;  %v1586_v15 = vmul.f32 %v3257_v8, %v1492_v59  ;;  %v1816_v59 = vld [vmem:[#allocation3 + $0xc] sm:$0x3] }
0x209e   :  { %v2625_v11 = vadd.f32 -1.0, %v1584_v10 }
0x20a0   :  { %1588 = vrot.lane.b32.xlu0 %v2625_v11, %s3488_s10 }
0x2112   :  { %v1589_v12 = vpop.permute.xlu0 %1588 }
0x2113   :  { %v1591_v14 = vmul.f32 %v3257_v8, %v1589_v12 }
0x2115   :  { %1593 = vrot.lane.b32.xlu1 %v1591_v14, %s3489_s3 }
0x2187   :  { %v1594_v16 = vpop.permute.xlu1 %1593 }
0x2188   :  { %v1596_v17 = vadd.f32 %v1594_v16, %v1586_v15 }
0x218a   :  { %3258 = vtanh.f32 %v1596_v17 }
0x2194   :  { %v3259_v18 = vpop.eup %3258 }
0x2195   :  { %1599 = vrot.lane.b32.xlu0 %v3259_v18, %s3488_s10 }
0x2207   :  { %v1600_v19 = vpop.permute.xlu0 %1599 }
0x2208   :  { %v1602_v20 = vmul.f32 %v3257_v8, %v1600_v19 }
0x220a   :  { %1604 = vrot.lane.b32.xlu1 %v1602_v20, %s3489_s3 }
0x227c   :  { %v1605_v21 = vpop.permute.xlu1 %1604 }
0x227d   :  { %1607 = vst.msk [vmem:[#allocation2 + $0x6] sm:$0x3] %vm350_vm2, %v1605_v21  ;;  %2932 = vmatmul.mubr.msk.f32.vlgmr.msra.gmra.mrb[14].mxu0 %vm246_vm3, %v1605_v21 }
0x227e   :  { %3120 = vmatpush3.bf16.msra.mxu0 %v3827_v56  ;;  %2953 = vmatprep.mubr.msk.f32.mxu0 %vm3486_vm0, %v3487_v2 }
0x227f   :  { %3121 = vmatprep.subr.bf16.mxu0 %v3485_v1 }
0x2282   :  { %3123 = vmatpush3.bf16.msra.mxu0 %v3833_v60 }
0x2284   :  { %v3916_v55 = vld [vmem:[#allocation2] sm:$0xff] }
0x2285   :  { %v2026_v58 = vmax.f32 %v3916_v55, 0.0 }
0x2350   :  { %v1677_v23 = vpop.f32.mrb[14].mxu0 }
0x2351   :  { %v1681_v24 = vadd.f32 %v1677_v23, %v1608_v22  ;;  %v2933_v25 = vpop.f32.mrb[15].mxu0 }
0x2353   :  { %v2627_v26 = vmul.f32 -1.442695, %v1681_v24 }
0x2355   :  { %3260 = vpow2.f32 %v2627_v26 }
0x235f   :  { %v3261_v27 = vpop.eup %3260 }
0x2360   :  { %v1685_v28 = vadd.f32 1.0, %v3261_v27 }
0x2362   :  { %3262 = vrcp.f32 %v1685_v28 }
0x236c   :  { %v3263_v29 = vpop.eup %3262 }
0x236d   :  { %v1688_v30 = vmul.f32 2.0, %v3263_v29  ;;  %v1690_v34 = vmul.f32 %v3263_v29, %v1596_v17  ;;  %v1920_v17 = vld [vmem:[#allocation3 + $0xe] sm:$0x3] }
0x236f   :  { %v2628_v31 = vadd.f32 -1.0, %v1688_v30 }
0x2371   :  { %1692 = vrot.lane.b32.xlu0 %v2628_v31, %s3488_s10 }
0x23e3   :  { %v1693_v32 = vpop.permute.xlu0 %1692 }
0x23e4   :  { %v1695_v33 = vmul.f32 %v3263_v29, %v1693_v32 }
0x23e6   :  { %1697 = vrot.lane.b32.xlu1 %v1695_v33, %s3489_s3  ;;  %v2028_v33 = vld [vmem:[#allocation8] sm:$0xff] }
0x2458   :  { %v1698_v35 = vpop.permute.xlu1 %1697 }
0x2459   :  { %v1700_v36 = vadd.f32 %v1698_v35, %v1690_v34  ;;  %v2029_v34 = vld [vmem:[#allocation8 + $0x8] sm:$0xff]  ;;  %v2030_v35 = vld [vmem:[#allocation8 + $0x10] sm:$0xff] }
0x245b   :  { %3264 = vtanh.f32 %v1700_v36 }
0x2465   :  { %v3265_v37 = vpop.eup %3264 }
0x2466   :  { %1703 = vrot.lane.b32.xlu0 %v3265_v37, %s3488_s10  ;;  %v2031_v37 = vld [vmem:[#allocation8 + $0x18] sm:$0xff] }
0x24d8   :  { %v1704_v38 = vpop.permute.xlu0 %1703 }
0x24d9   :  { %v1706_v39 = vmul.f32 %v3263_v29, %v1704_v38  ;;  %v3134_v38 = vpack.c.bf16 %v2031_v37, %v2030_v35 }
0x24db   :  { %1708 = vrot.lane.b32.xlu1 %v1706_v39, %s3489_s3 }
0x254d   :  { %v1709_v40 = vpop.permute.xlu1 %1708 }
0x254e   :  { %1711 = vst.msk [vmem:[#allocation2 + $0x8] sm:$0x3] %vm350_vm2, %v1709_v40  ;;  %2943 = vmatmul.mubr.msk.f32.vlgmr.msra.gmra.mrb[14].mxu1 %vm246_vm3, %v1709_v40  ;;  %v2122_v40 = vld [vmem:[#allocation11] sm:$0xff] }
0x254f   :  { %3126 = vmatpush3.bf16.msra.mxu1 %v3827_v56  ;;  %2964 = vmatprep.mubr.msk.f32.mxu1 %vm3486_vm0, %v3487_v2 }
0x2550   :  { %3127 = vmatprep.subr.bf16.mxu1 %v3485_v1 }
0x2553   :  { %3129 = vmatpush3.bf16.msra.mxu1 %v3833_v60 }
0x2621   :  { %v1781_v42 = vpop.f32.mrb[14].mxu1 }
0x2622   :  { %v1785_v43 = vadd.f32 %v1781_v42, %v1712_v41  ;;  %v2944_v44 = vpop.f32.mrb[15].mxu1  ;;  %v2123_v41 = vld [vmem:[#allocation11 + $0x8] sm:$0xff] }
0x2624   :  { %v2630_v45 = vmul.f32 -1.442695, %v1785_v43  ;;  %v3138_v43 = vpack.c.bf16 %v2123_v41, %v2122_v40 }
0x2626   :  { %3266 = vpow2.f32 %v2630_v45  ;;  %3139 = vmatprep.subr.bf16.mxu1 %v3138_v43 }
0x2630   :  { %v3267_v46 = vpop.eup %3266 }
0x2631   :  { %v1789_v47 = vadd.f32 1.0, %v3267_v46 }
0x2633   :  { %3268 = vrcp.f32 %v1789_v47  ;;  %v2124_v47 = vld [vmem:[#allocation11 + $0x10] sm:$0xff] }
0x263d   :  { %v3269_v48 = vpop.eup %3268 }
0x263e   :  { %v1792_v49 = vmul.f32 2.0, %v3269_v48  ;;  %v1794_v1 = vmul.f32 %v3269_v48, %v1700_v36  ;;  %v3130_v36 = vpack.c.bf16 %v2029_v34, %v2028_v33 }
0x2640   :  { %v2631_v50 = vadd.f32 -1.0, %v1792_v49  ;;  %3131 = vmatprep.subr.bf16.mxu0 %v3130_v36 }
0x2642   :  { %1796 = vrot.lane.b32.xlu0 %v2631_v50, %s3488_s10  ;;  %v2306_v50 = vld [vmem:[%s4013_s13] sm:$0xff] }
0x26b4   :  { %v1797_v56 = vpop.permute.xlu0 %1796 }
0x26b5   :  { %v1799_v2 = vmul.f32 %v3269_v48, %v1797_v56  ;;  %v2307_v56 = vld [vmem:[%s4013_s13 + $0x8] sm:$0xff] }
0x26b7   :  { %1801 = vrot.lane.b32.xlu1 %v1799_v2, %s3489_s3  ;;  %v3154_v2 = vpack.c.bf16 %v2307_v56, %v2306_v50 }
0x2729   :  { %v1802_v60 = vpop.permute.xlu1 %1801 }
0x272a   :  { %v1804_v51 = vadd.f32 %v1802_v60, %v1794_v1  ;;  %v2214_v1 = vld [vmem:[%s4011_s11] sm:$0xff]  ;;  %v2215_v60 = vld [vmem:[%s4011_s11 + $0x8] sm:$0xff] }
0x272c   :  { %3270 = vtanh.f32 %v1804_v51 }
0x2736   :  { %v3271_v52 = vpop.eup %3270 }
0x2737   :  { %1807 = vrot.lane.b32.xlu0 %v3271_v52, %s3488_s10  ;;  %v2638_v52 = vld [vmem:[#allocation10] ss:$0 sm:$0xff] }
0x27a9   :  { %v1808_v53 = vpop.permute.xlu0 %1807 }
0x27aa   :  { %v1810_v54 = vmul.f32 %v3269_v48, %v1808_v53  ;;  %v2125_v48 = vld [vmem:[#allocation11 + $0x18] sm:$0xff] }
0x27ab   :  { %v3142_v49 = vpack.c.bf16 %v2125_v48, %v2124_v47 }
0x27ac   :  { %1812 = vrot.lane.b32.xlu1 %v1810_v54, %s3489_s3 }
0x281e   :  { %v1813_v57 = vpop.permute.xlu1 %1812 }
0x281f   :  { %1815 = vst.msk [vmem:[#allocation2 + $0xa] sm:$0x3] %vm350_vm2, %v1813_v57  ;;  %2954 = vmatmul.mubr.msk.f32.vlgmr.msra.gmra.mrb[16].mxu0 %vm246_vm3, %v1813_v57 }
0x2820   :  { %2975 = vmatprep.mubr.msk.f32.mxu0 %vm246_vm3, %v2026_v58  ;;  %3133 = vmatpush3.bf16.msra.mxu0 %v3130_v36 }
0x2821   :  { %3135 = vmatprep.subr.bf16.mxu0 %v3134_v38 }
0x2824   :  { %3137 = vmatpush3.bf16.msra.mxu0 %v3134_v38 }
0x28f2   :  { %v1885_v61 = vpop.f32.mrb[16].mxu0 }
0x28f3   :  { %v1889_v9 = vadd.f32 %v1885_v61, %v1816_v59  ;;  %v2955_v62 = vpop.f32.mrb[17].mxu0  ;;  %v2308_v59 = vld [vmem:[%s4013_s13 + $0x10] sm:$0xff]  ;;  %v2309_v61 = vld [vmem:[%s4013_s13 + $0x18] sm:$0xff] }
0x28f5   :  { %v2633_v63 = vmul.f32 -1.442695, %v1889_v9 }
0x28f7   :  { %3272 = vpow2.f32 %v2633_v63  ;;  %v3158_v63 = vpack.c.bf16 %v2309_v61, %v2308_v59  ;;  %v2644_v61 = vld [vmem:[#allocation14] ss:$0 sm:$0xff] }
0x2901   :  { %v3273_v0 = vpop.eup %3272 }
0x2902   :  { %v1893_v13 = vadd.f32 1.0, %v3273_v0  ;;  %v2216_v0 = vld [vmem:[%s4011_s11 + $0x10] sm:$0xff] }
0x2904   :  { %3274 = vrcp.f32 %v1893_v13  ;;  %v2217_v13 = vld [vmem:[%s4011_s11 + $0x18] sm:$0xff] }
0x290e   :  { %v3275_v3 = vpop.eup %3274 }
0x290f   :  { %v1896_v4 = vmul.f32 2.0, %v3275_v3  ;;  %v1898_v8 = vmul.f32 %v3275_v3, %v1804_v51  ;;  %v3146_v51 = vpack.c.bf16 %v2215_v60, %v2214_v1 }
0x2911   :  { %v2634_v5 = vadd.f32 -1.0, %v1896_v4  ;;  %3147 = vmatprep.subr.bf16.mxu0 %v3146_v51  ;;  %v2400_v4 = vld [vmem:[%s4015_s15] sm:$0xff] }
0x2913   :  { %1900 = vrot.lane.b32.xlu0 %v2634_v5, %s3488_s10 }
0x2985   :  { %v1901_v6 = vpop.permute.xlu0 %1900 }
0x2986   :  { %v1903_v7 = vmul.f32 %v3275_v3, %v1901_v6  ;;  %v2641_v6 = vld [vmem:[#allocation13] ss:$0 sm:$0xff] }
0x2988   :  { %1905 = vrot.lane.b32.xlu1 %v1903_v7, %s3489_s3 }
0x29fa   :  { %v1906_v10 = vpop.permute.xlu1 %1905 }
0x29fb   :  { %v1908_v11 = vadd.f32 %v1906_v10, %v1898_v8  ;;  %v2402_v8 = vld [vmem:[%s4015_s15 + $0x10] sm:$0xff]  ;;  %v2403_v10 = vld [vmem:[%s4015_s15 + $0x18] sm:$0xff] }
0x29fd   :  { %3276 = vtanh.f32 %v1908_v11 }
0x2a07   :  { %v3277_v12 = vpop.eup %3276 }
0x2a08   :  { %1911 = vrot.lane.b32.xlu0 %v3277_v12, %s3488_s10 }
0x2a7a   :  { %v1912_v14 = vpop.permute.xlu0 %1911 }
0x2a7b   :  { %v1914_v15 = vmul.f32 %v3275_v3, %v1912_v14  ;;  %v3150_v3 = vpack.c.bf16 %v2217_v13, %v2216_v0 }
0x2a7d   :  { %1916 = vrot.lane.b32.xlu1 %v1914_v15, %s3489_s3  ;;  %v3166_v15 = vpack.c.bf16 %v2403_v10, %v2402_v8 }
0x2aef   :  { %v1917_v16 = vpop.permute.xlu1 %1916 }
0x2af0   :  { %1919 = vst.msk [vmem:[#allocation2 + $0xc] sm:$0x3] %vm350_vm2, %v1917_v16  ;;  %2965 = vmatmul.mubr.msk.f32.vlgmr.msra.gmra.mrb[16].mxu1 %vm246_vm3, %v1917_v16  ;;  %v2647_v16 = vld [vmem:[#allocation16] ss:$0 sm:$0xff] }
0x2af1   :  { %3141 = vmatpush3.bf16.msra.mxu1 %v3138_v43 }
0x2af2   :  { %3143 = vmatprep.subr.bf16.mxu1 %v3142_v49 }
0x2af5   :  { %3145 = vmatpush3.bf16.msra.mxu1 %v3142_v49 }
0x2af6   :  { %3155 = vmatprep.subr.bf16.mxu1 %v3154_v2 }
0x2bc3   :  { %v1989_v18 = vpop.f32.mrb[16].mxu1 }
0x2bc4   :  { %v1993_v19 = vadd.f32 %v1989_v18, %v1920_v17  ;;  %v2966_v20 = vpop.f32.mrb[17].mxu1 }
0x2bc6   :  { %v2636_v21 = vmul.f32 -1.442695, %v1993_v19 }
0x2bc8   :  { %3278 = vpow2.f32 %v2636_v21 }
0x2bd2   :  { %v3279_v22 = vpop.eup %3278 }
0x2bd3   :  { %v1997_v23 = vadd.f32 1.0, %v3279_v22 }
0x2bd5   :  { %3280 = vrcp.f32 %v1997_v23  ;;  %v3490_v23 = vmov 0  }
0x2bd6   :  { %3187 = vset.pattern.permute.xlu1 %v3490_v23  ;;  %3186 = vset.pattern.permute.xlu0 %v3490_v23 }
0x2bdf   :  { %v3281_v24 = vpop.eup %3280 }
0x2be0   :  { %v2000_v25 = vmul.f32 2.0, %v3281_v24  ;;  %v2002_v29 = vmul.f32 %v3281_v24, %v1908_v11 }
0x2be2   :  { %v2637_v26 = vadd.f32 -1.0, %v2000_v25 }
0x2be4   :  { %2004 = vrot.lane.b32.xlu0 %v2637_v26, %s3488_s10  ;;  %v2650_v26 = vld [vmem:[#allocation4] ss:$0 sm:$0xff] }
0x2c56   :  { %v2005_v27 = vpop.permute.xlu0 %2004 }
0x2c57   :  { %v2007_v28 = vmul.f32 %v3281_v24, %v2005_v27 }
0x2c59   :  { %2009 = vrot.lane.b32.xlu1 %v2007_v28, %s3489_s3 }
0x2ccb   :  { %v2010_v30 = vpop.permute.xlu1 %2009 }
0x2ccc   :  { %v2012_v31 = vadd.f32 %v2010_v30, %v2002_v29 }
0x2cce   :  { %3282 = vtanh.f32 %v2012_v31 }
0x2cd8   :  { %v3283_v32 = vpop.eup %3282 }
0x2cd9   :  { %2015 = vrot.lane.b32.xlu0 %v3283_v32, %s3488_s10 }
0x2d4b   :  { %v2016_v39 = vpop.permute.xlu0 %2015 }
0x2d4c   :  { %v2018_v42 = vmul.f32 %v3281_v24, %v2016_v39 }
0x2d4e   :  { %2020 = vrot.lane.b32.xlu1 %v2018_v42, %s3489_s3 }
0x2dc0   :  { %v2021_v44 = vpop.permute.xlu1 %2020 }
0x2dc1   :  { %2023 = vst.msk [vmem:[#allocation2 + $0xe] sm:$0x3] %vm350_vm2, %v2021_v44 }
0x2dc8   :  { %v2025_v45 = vld [vmem:[#allocation2 + $0x8] sm:$0xff] }
0x2dc9   :  { %v2027_v46 = vmax.f32 %v2025_v45, 0.0 }
0x2dcb   :  { %2976 = vmatmul.mubr.msk.f32.vlgmr.msra.gmra.mrb[18].mxu0 %vm246_vm3, %v2027_v46 }
0x2dcc   :  { %3149 = vmatpush3.bf16.msra.mxu0 %v3146_v51 }
0x2dcd   :  { %3151 = vmatprep.subr.bf16.mxu0 %v3150_v3 }
0x2dd0   :  { %3153 = vmatpush3.bf16.msra.mxu0 %v3150_v3 }
0x2e9e   :  { %v2977_v53 = vpop.f32.mrb[18].mxu0 }
0x2e9f   :  { %v2117_v54 = vadd.f32 %v2977_v53, %v2638_v52  ;;  %v2111_v57 = vpop.f32.mrb[19].mxu0 }
0x2ea0   :  { %v2112_v58 = vadd.f32 %v2638_v52, %v2111_v57 }
0x2ea1   :  { %v2121_v62 = vmax.f32 %v2117_v54, 0.0  ;;  %v2544_v54 = vlaneseq }
0x2ea2   :  { %v2120_v9 = vmax.f32 %v2112_v58, 0.0 }
0x2ea3   :  { %v2545_v57 = vshrl.u32 %v2544_v54, 7  ;;  %v2548_v59 = vand.u32 127, %v2544_v54 }
0x2ea4   :  { %2986 = vmatprep.mubr.msk.f32.mxu1 %vm246_vm3, %v2120_v9 }
0x2ea5   :  { %2987 = vmatmul.mubr.msk.f32.vlgmr.msra.gmra.mrb[18].mxu1 %vm246_vm3, %v2121_v62  ;;  %v2546_v58 = vadd.s32 8, %v2545_v57  ;;  %vm2549_vm6 = vcmp.eq.s32.totalorder %v2545_v57, %v2548_v59 }
0x2ea6   :  { %3157 = vmatpush3.bf16.msra.mxu1 %v3154_v2  ;;  %3008 = vmatprep.mubr.msk.f32.mxu1 %vm246_vm3, %v3916_v55  ;;  %v2401_v55 = vld [vmem:[%s4015_s15 + $0x8] sm:$0xff]  ;;  %s3491_s15 = smov [#allocation17]  }
0x2ea7   :  { %3159 = vmatprep.subr.bf16.mxu1 %v3158_v63  ;;  %v3162_v5 = vpack.c.bf16 %v2401_v55, %v2400_v4  ;;  %vm2550_vm5 = vcmp.eq.s32.totalorder %v2546_v58, %v2548_v59  ;;  %s2570_s24 = sshll.u32 %s3491_s15, 4  ;;  %s2571_s24 = int_to_ptr.vmem [resolvable:$true] %s2570_s24 }
0x2ea8   :  { %s3444_s30 = scalar_lea.vmem %s2571_s24, 16  ;;  %s3448_s5 = scalar_lea.vmem %s2571_s24, 32 }
0x2ea9   :  { %3163 = vmatprep.subr.bf16.mxu0 %v3162_v5  ;;  %p3445_p0 = scmp.ne.s32.totalorder %s2571_s24, %s3444_s30  ;;  %p3449_p1 = scmp.lt.s32.totalorder %s2571_s24, %s2571_s24 }
0x2eaa   :  { %3161 = vmatpush3.bf16.msra.mxu1 %v3158_v63  ;;  %p3450_p2 = scmp.lt.s32.totalorder %s3448_s5, %s3444_s30 }
0x2eac   :  { %p3451_p3 = por %p3450_p2, %p3449_p1 }
0x2ead   :  { %3009 = vmatmul.mubr.msk.f32.vlgmr.msra.gmra.mrb[20].mxu1 %vm246_vm3, %v2025_v45 }
0x2eae   :  { %p3452_p4 = pnand %p3451_p3, %p3445_p0 }
0x2f78   :  { %v2988_v7 = vpop.f32.mrb[18].mxu1 }
0x2f79   :  { %v2205_v11 = vpop.f32.mrb[19].mxu1  ;;  %v2211_v14 = vadd.f32 %v2988_v7, %v2641_v6 }
0x2f7a   :  { %v2206_v12 = vadd.f32 %v2641_v6, %v2205_v11 }
0x2f7c   :  { %2997 = vmatprep.mubr.msk.f32.mxu0 %vm246_vm3, %v2206_v12 }
0x2f7d   :  { %2998 = vmatmul.mubr.msk.f32.vlgmr.msra.gmra.mrb[20].mxu0 %vm246_vm3, %v2211_v14 }
0x2f7e   :  { %3165 = vmatpush3.bf16.msra.mxu0 %v3162_v5 }
0x2f7f   :  { %3167 = vmatprep.subr.bf16.mxu0 %v3166_v15 }
0x2f80   :  { %v3010_v17 = vpop.f32.mrb[20].mxu1 }
0x2f81   :  { %v2395_v18 = vadd.f32 %v3010_v17, %v2647_v16  ;;  %v2389_v19 = vpop.f32.mrb[21].mxu1 }
0x2f82   :  { %v2390_v20 = vadd.f32 %v2647_v16, %v2389_v19  ;;  %3169 = vmatpush3.bf16.msra.mxu0 %v3166_v15 }
0x2f83   :  { %v2399_v22 = vmax.f32 %v2395_v18, 0.0 }
0x2f84   :  { %v2398_v21 = vmax.f32 %v2390_v20, 0.0 }
0x2f86   :  { %3019 = vmatprep.mubr.msk.f32.mxu0 %vm246_vm3, %v2398_v21 }
0x2f87   :  { %3020 = vmatmul.mubr.msk.f32.vlgmr.msra.gmra.mrb[22].mxu0 %vm246_vm3, %v2399_v22 }
0x3050   :  { %v2999_v24 = vpop.f32.mrb[20].mxu0 }
0x3051   :  { %v2297_v25 = vpop.f32.mrb[21].mxu0  ;;  %v2303_v9 = vadd.f32 %v2999_v24, %v2644_v61 }
0x3052   :  { %v2298_v62 = vadd.f32 %v2644_v61, %v2297_v25 }
0x305a   :  { %v3021_v27 = vpop.f32.mrb[22].mxu0 }
0x305b   :  { %v2489_v28 = vadd.f32 %v3021_v27, %v2650_v26  ;;  %v2483_v29 = vpop.f32.mrb[23].mxu0 }
0x305c   :  { %v2484_v30 = vadd.f32 %v2650_v26, %v2483_v29 }
0x305d   :  { %v2494_v31 = vsel %vm2492_vm4, %v2489_v28, -inf }
0x305e   :  { %v2493_v32 = vsel %vm2492_vm4, %v2484_v30, -inf }
0x305f   :  { %v2495_v33 = vmax.f32 %v2493_v32, %v2494_v31 }
0x3061   :  { %v2496_v34 = vrot.slane %v2495_v33, 4 }
0x3063   :  { %v2497_v35 = vmax.f32 %v2495_v33, %v2496_v34 }
0x3065   :  { %v2498_v36 = vrot.slane %v2497_v35, 2 }
0x3067   :  { %v2499_v37 = vmax.f32 %v2497_v35, %v2498_v36 }
0x3069   :  { %v2500_v38 = vrot.slane %v2499_v37, 1 }
0x306b   :  { %v2501_v39 = vmax.f32 %v2499_v37, %v2500_v38 }
0x306d   :  { %v2502_v40 = vsub.f32 %v2484_v30, %v2501_v39  ;;  %v2503_v41 = vsub.f32 %v2489_v28, %v2501_v39 }
0x306f   :  { %v2504_v42 = vmul.f32 1.442695, %v2502_v40  ;;  %v2506_v43 = vmul.f32 1.442695, %v2503_v41 }
0x3071   :  { %3284 = vpow2.f32 %v2504_v42 }
0x3072   :  { %3286 = vpow2.f32 %v2506_v43 }
0x307b   :  { %v3285_v44 = vpop.eup %3284 }
0x307c   :  { %v3287_v45 = vpop.eup %3286  ;;  %v2508_v46 = vsel %vm2492_vm4, %v3285_v44, 0.0 }
0x307d   :  { %v2509_v47 = vsel %vm2492_vm4, %v3287_v45, 0.0 }
0x307e   :  { %v2510_v48 = vadd.f32 %v2509_v47, %v2508_v46 }
0x3080   :  { %v2511_v49 = vrot.slane %v2510_v48, 4 }
0x3082   :  { %v2512_v50 = vadd.f32 %v2511_v49, %v2510_v48 }
0x3084   :  { %v2513_v56 = vrot.slane %v2512_v50, 2 }
0x3086   :  { %v2514_v2 = vadd.f32 %v2513_v56, %v2512_v50 }
0x3088   :  { %v2515_v1 = vrot.slane %v2514_v2, 1 }
0x308a   :  { %v2516_v60 = vadd.f32 %v2515_v1, %v2514_v2 }
0x308c   :  { %3288 = vrcp.f32 %v2516_v60 }
0x3096   :  { %v3289_v51 = vpop.eup %3288 }
0x3097   :  { %v2519_v52 = vmul.f32 %v3289_v51, %v3287_v45  ;;  %v2518_v53 = vmul.f32 %v3289_v51, %v3285_v44 }
0x3099   :  { %2527 = vperm.xlu1 %3187, %v2519_v52   ;;  %2522 = vperm.xlu0 %3186, %v2518_v53  }
0x3118   :  { %v2528_v63 = vpop.permute.xlu1 %2527  ;;  %v2523_v0 = vpop.permute.xlu0 %2522 }
0x3119   :  { %v2531_v13 = vmul.f32 %v2528_v63, %v2303_v9  ;;  %v2552_v3 = vsel %vm2550_vm5, %v2528_v63, 0.0  ;;  %v2530_v4 = vmul.f32 %v2523_v0, %v2298_v62  ;;  %v2551_v55 = vsel %vm2549_vm6, %v2523_v0, 0.0 }
0x311a   :  { %v2554_v5 = vsel %vm161_vm1, %v2552_v3, 0.0  ;;  %v2553_v6 = vsel %vm161_vm1, %v2551_v55, 0.0 }
0x311b   :  { %v2534_v7 = vsel %vm2532_vm7, %v2531_v13, 0.0  ;;  %v2533_v8 = vsel %vm2532_vm7, %v2530_v4, 0.0  ;;  %v2555_v10 = vadd.f32 %v2554_v5, %v2553_v6 }
0x311c   :  { %v2535_v11 = vadd.f32 %v2534_v7, %v2533_v8 }
0x311d   :  { %v2556_v12 = vrot.slane %v2555_v10, 4 }
0x311e   :  { %v2536_v14 = vrot.slane %v2535_v11, 4 }
0x311f   :  { %v2557_v15 = vadd.f32 %v2556_v12, %v2555_v10 }
0x3120   :  { %v2537_v16 = vadd.f32 %v2536_v14, %v2535_v11 }
0x3121   :  { %v2558_v17 = vrot.slane %v2557_v15, 2 }
0x3122   :  { %v2538_v18 = vrot.slane %v2537_v16, 2 }
0x3123   :  { %v2559_v19 = vadd.f32 %v2558_v17, %v2557_v15 }
0x3124   :  { %v2539_v20 = vadd.f32 %v2538_v18, %v2537_v16 }
0x3125   :  { %v2560_v21 = vrot.slane %v2559_v19, 1 }
0x3126   :  { %v2540_v22 = vrot.slane %v2539_v20, 1 }
0x3127   :  { %v2561_v23 = vadd.f32 %v2560_v21, %v2559_v19 }
0x3128   :  { %v2541_v24 = vadd.f32 %v2540_v22, %v2539_v20 }
0x3129   :  { %2563 = vst.msk [vmem:[%s4018_s18] sm:$0x1] %vm2562_vm8, %v2561_v23 }
0x312a   :  { %2543 = vst.msk [vmem:[#allocation17] sm:$0x1] %vm2542_vm9, %v2541_v24 }
0x312b   :  { %3455 = shalt.err (!%p3452_p4)
}
0x312c   :  { %s3456_s6 = scalar_lea.hbm %s4017_s17, 16 }
0x312d   :  { %p3457_p5 = scmp.ne.s32.totalorder %s4017_s17, %s3456_s6  ;;  %p3460_p6 = scmp.lt.u32.totalorder %s3456_s6, %s4017_s17 }
0x312f   :  { %p3462_p7 = pnand %p3460_p6, %p3457_p5 }
0x3131   :  { %3465 = shalt.err (!%p3462_p7)
}
0x3132   :  { %2573 = dma.vmem_to_hbm [thread:$0]  %s2571_s24, 16, %s4017_s17, [#allocation7]  }
0x3133   :  { %3474 = dma.done.wait [#allocation7], 16  }
0x3134   :  { %3475 = vsyncadd [#allocation7], 4294967280 }
0x3135   :  { %2581 = vsyncpa [#allocation6], 1 }
0x3136   :  { %2582 = vsyncpa [#allocation9], 1 }
0x3137   :  { %2583 = vsyncpa [#allocation12], 1 }
0x3138   :  { %2584 = vsyncpa [#allocation15], 1 }
0x3139   :  { %2585 = vsyncpa [#allocation7], 1 }

</bundles_post_ra>
